<compile_context>
chip_gen: v7x
topology: tpu7x:2x2x1
jax: 0.10.0
libtpu: 0.0.40
codegen_flags: <defaults>
</compile_context>

<pallas_src>
import jax
import jax.numpy as jnp
from jax.experimental import pallas as pl
from jax.experimental.pallas import tpu as pltpu


def _mlp_kernel(x_ref, w1_ref, b1_ref, w2_ref, b2_ref,
                w3_ref, b3_ref, w4_ref, b4_ref, o_ref):
    # x_ref / w*_ref are bf16; MXU consumes bf16 directly with f32 accumulate.
    # Post-matmul math (bias, ReLU, log-softmax) stays in f32.
    h = jnp.dot(x_ref[...], w1_ref[...],
                preferred_element_type=jnp.float32) + b1_ref[...]
    h = jnp.maximum(h, 0.0)                         # Dropout (eval) -> ReLU

    h = jnp.dot(h.astype(jnp.bfloat16), w2_ref[...],
                preferred_element_type=jnp.float32) + b2_ref[...]
    h = jnp.maximum(h, 0.0)

    h = jnp.dot(h.astype(jnp.bfloat16), w3_ref[...],
                preferred_element_type=jnp.float32) + b3_ref[...]
    h = jnp.maximum(h, 0.0)

    logits = jnp.dot(h.astype(jnp.bfloat16), w4_ref[...],
                     preferred_element_type=jnp.float32) + b4_ref[...]

    # LogSoftmax(dim=1), numerically stable.
    m = jnp.max(logits, axis=-1, keepdims=True)
    shifted = logits - m
    lse = jnp.log(jnp.sum(jnp.exp(shifted), axis=-1, keepdims=True))
    o_ref[...] = shifted - lse


def mnist_forward(image, params, *, batch_tile=256):
    """image: (B, 1, 28, 28) float32 NCHW. Returns (B, 10) log-probabilities."""
    w1, b1, w2, b2, w3, b3, w4, b4 = params
    B = image.shape[0]

    # Flatten and cast activations to bf16 (f32 accumulation happens on-MXU).
    x = image.reshape(B, -1).astype(jnp.bfloat16)            # (B, 784)

    bt = batch_tile                                          # multiple of 128
    n_blocks = pl.cdiv(B, bt)
    B_pad = n_blocks * bt
    if B_pad != B:
        x = jnp.pad(x, ((0, B_pad - B), (0, 0)))             # zero rows, sliced off below

    # Weights in bf16 (halves HBM/VMEM traffic); biases stay f32.
    w1b, w2b, w3b, w4b = (w.astype(jnp.bfloat16) for w in (w1, w2, w3, w4))

    def rep(shape):  # full-array (grid-invariant / resident) spec
        return pl.BlockSpec(shape, lambda i: tuple(0 for _ in shape))

    n_wparam = sum(int(w.size) for w in (w1, w2, w3, w4))    # 242304
    n_bparam = sum(int(b.size) for b in (b1, b2, b3, b4))
    cost = pl.CostEstimate(
        flops=2 * B_pad * n_wparam,
        transcendentals=11 * B_pad,                          # exp x10 + log per row
        bytes_accessed=B_pad * 784 * 2 + n_wparam * 2 + n_bparam * 4 + B_pad * 10 * 4,
    )

    out = pl.pallas_call(
        _mlp_kernel,
        out_shape=jax.ShapeDtypeStruct((B_pad, 10), jnp.float32),
        grid_spec=pltpu.PrefetchScalarGridSpec(
            num_scalar_prefetch=0,
            grid=(n_blocks,),
            in_specs=[
                pl.BlockSpec((bt, 784), lambda i: (i, 0)),
                rep((784, 256)), rep((1, 256)),
                rep((256, 128)), rep((1, 128)),
                rep((128, 64)),  rep((1, 64)),
                rep((64, 10)),   rep((1, 10)),
            ],
            out_specs=pl.BlockSpec((bt, 10), lambda i: (i, 0)),
        ),
        compiler_params=pltpu.CompilerParams(
            dimension_semantics=("parallel",),               # megacore-shardable
            vmem_limit_bytes=32 * 1024 * 1024,
        ),
        cost_estimate=cost,
    )(x, w1b, b1, w2b, b2, w3b, b3, w4b, b4)

    return out[:B] if B_pad != B else out


def init_params(key):
    """Deterministic synthetic parameters (shapes from MNISTModel.__init__)."""
    dims = [(784, 256), (256, 128), (128, 64), (64, 10)]
    params = []
    keys = jax.random.split(key, len(dims) * 2)
    for idx, (fan_in, fan_out) in enumerate(dims):
        bound = 1.0 / jnp.sqrt(fan_in)
        w = jax.random.uniform(keys[2 * idx], (fan_in, fan_out),
                               jnp.float32, -bound, bound)
        b = jax.random.uniform(keys[2 * idx + 1], (1, fan_out),
                               jnp.float32, -bound, bound)
        params += [w, b]
    return tuple(params)


def _reference(image, params):
    """Pure-JAX reference with the same bf16-input / f32-accumulate recipe."""
    w1, b1, w2, b2, w3, b3, w4, b4 = params

    def lin(a, w, b):
        return jnp.dot(a.astype(jnp.bfloat16), w.astype(jnp.bfloat16),
                       preferred_element_type=jnp.float32) + b

    x = image.reshape(image.shape[0], -1)
    h = jnp.maximum(lin(x, w1, b1), 0.0)
    h = jnp.maximum(lin(h, w2, b2), 0.0)
    h = jnp.maximum(lin(h, w3, b3), 0.0)
    return jax.nn.log_softmax(lin(h, w4, b4), axis=1)


if __name__ == "__main__":
    key = jax.random.PRNGKey(0)
    k_img, k_par = jax.random.split(key)
    # Small MNIST-like batch: (B, C, H, W) = (8, 1, 28, 28) -> flattens to 784.
    # B=8 is NOT a tile multiple: exercises the pad-and-slice path.
    image = jax.random.normal(k_img, (8, 1, 28, 28), jnp.float32)
    params = init_params(k_par)

    out = jax.block_until_ready(mnist_forward(image, params))

    ref = _reference(image, params)
    assert out.shape == (8, 10)
    assert jnp.allclose(out, ref, atol=1e-3, rtol=1e-3), \
        float(jnp.max(jnp.abs(out - ref)))
    # rows must be valid log-prob distributions
    assert jnp.allclose(jnp.sum(jnp.exp(out), axis=1), 1.0, atol=1e-3)
    print("KERNEL_OK")
</pallas_src>

<mosaic_0001>
module attributes {stable_mosaic.version = 11 : i64} {
  func.func @_mlp_kernel(%arg0: i32, %arg1: memref<256x784xbf16, #tpu.memory_space<vmem>>, %arg2: memref<784x256xbf16, #tpu.memory_space<vmem>>, %arg3: memref<1x256xf32, #tpu.memory_space<vmem>>, %arg4: memref<256x128xbf16, #tpu.memory_space<vmem>>, %arg5: memref<1x128xf32, #tpu.memory_space<vmem>>, %arg6: memref<128x64xbf16, #tpu.memory_space<vmem>>, %arg7: memref<1x64xf32, #tpu.memory_space<vmem>>, %arg8: memref<64x10xbf16, #tpu.memory_space<vmem>>, %arg9: memref<1x10xf32, #tpu.memory_space<vmem>>, %arg10: memref<256x10xf32, #tpu.memory_space<vmem>>) attributes {dimension_semantics = [#tpu.dimension_semantics<parallel>], iteration_bounds = array<i64: 1>, scalar_prefetch = 0 : i64, scratch_operands = 0 : i64, tpu.core_type = #tpu.core_type<tc>, window_params = [{transform_indices = @transform_0, window_bounds = array<i64: 256, 784>}, {pipeline_mode = #tpu.pipeline_mode<synchronous>, transform_indices = @transform_1, window_bounds = array<i64: 784, 256>}, {pipeline_mode = #tpu.pipeline_mode<synchronous>, transform_indices = @transform_2, window_bounds = array<i64: 1, 256>}, {pipeline_mode = #tpu.pipeline_mode<synchronous>, transform_indices = @transform_3, window_bounds = array<i64: 256, 128>}, {pipeline_mode = #tpu.pipeline_mode<synchronous>, transform_indices = @transform_4, window_bounds = array<i64: 1, 128>}, {pipeline_mode = #tpu.pipeline_mode<synchronous>, transform_indices = @transform_5, window_bounds = array<i64: 128, 64>}, {pipeline_mode = #tpu.pipeline_mode<synchronous>, transform_indices = @transform_6, window_bounds = array<i64: 1, 64>}, {pipeline_mode = #tpu.pipeline_mode<synchronous>, transform_indices = @transform_7, window_bounds = array<i64: 64, 10>}, {pipeline_mode = #tpu.pipeline_mode<synchronous>, transform_indices = @transform_8, window_bounds = array<i64: 1, 10>}, {transform_indices = @transform_9, window_bounds = array<i64: 256, 10>}]} {
    %c0 = arith.constant 0 : index
    %c0_0 = arith.constant 0 : index
    %0 = vector.load %arg1[%c0, %c0_0] : memref<256x784xbf16, #tpu.memory_space<vmem>>, vector<256x784xbf16>
    %c0_1 = arith.constant 0 : index
    %c0_2 = arith.constant 0 : index
    %1 = vector.load %arg2[%c0_1, %c0_2] : memref<784x256xbf16, #tpu.memory_space<vmem>>, vector<784x256xbf16>
    %cst = arith.constant dense<0.000000e+00> : vector<256x256xf32>
    %2 = tpu.matmul %0, %1, %cst {dimension_numbers = #tpu.dot_dimension_numbers<[1], [0], [0], [1], [0, 0, 1, 1], [], []>} : vector<256x784xbf16>, vector<784x256xbf16>, vector<256x256xf32> -> vector<256x256xf32>
    %c0_3 = arith.constant 0 : index
    %c0_4 = arith.constant 0 : index
    %3 = vector.load %arg3[%c0_3, %c0_4] : memref<1x256xf32, #tpu.memory_space<vmem>>, vector<1x256xf32>
    %4 = vector.broadcast %3 : vector<1x256xf32> to vector<256x256xf32>
    %5 = arith.addf %2, %4 : vector<256x256xf32>
    %cst_5 = arith.constant 0.000000e+00 : f32
    %6 = vector.broadcast %cst_5 : f32 to vector<256x256xf32>
    %7 = arith.maximumf %5, %6 : vector<256x256xf32>
    %8 = arith.truncf %7 : vector<256x256xf32> to vector<256x256xbf16>
    %c0_6 = arith.constant 0 : index
    %c0_7 = arith.constant 0 : index
    %9 = vector.load %arg4[%c0_6, %c0_7] : memref<256x128xbf16, #tpu.memory_space<vmem>>, vector<256x128xbf16>
    %cst_8 = arith.constant dense<0.000000e+00> : vector<256x128xf32>
    %10 = tpu.matmul %8, %9, %cst_8 {dimension_numbers = #tpu.dot_dimension_numbers<[1], [0], [0], [1], [0, 0, 1, 1], [], []>} : vector<256x256xbf16>, vector<256x128xbf16>, vector<256x128xf32> -> vector<256x128xf32>
    %c0_9 = arith.constant 0 : index
    %c0_10 = arith.constant 0 : index
    %11 = vector.load %arg5[%c0_9, %c0_10] : memref<1x128xf32, #tpu.memory_space<vmem>>, vector<1x128xf32>
    %12 = vector.broadcast %11 : vector<1x128xf32> to vector<256x128xf32>
    %13 = arith.addf %10, %12 : vector<256x128xf32>
    %cst_11 = arith.constant 0.000000e+00 : f32
    %14 = vector.broadcast %cst_11 : f32 to vector<256x128xf32>
    %15 = arith.maximumf %13, %14 : vector<256x128xf32>
    %16 = arith.truncf %15 : vector<256x128xf32> to vector<256x128xbf16>
    %c0_12 = arith.constant 0 : index
    %c0_13 = arith.constant 0 : index
    %17 = vector.load %arg6[%c0_12, %c0_13] : memref<128x64xbf16, #tpu.memory_space<vmem>>, vector<128x64xbf16>
    %cst_14 = arith.constant dense<0.000000e+00> : vector<256x64xf32>
    %18 = tpu.matmul %16, %17, %cst_14 {dimension_numbers = #tpu.dot_dimension_numbers<[1], [0], [0], [1], [0, 0, 1, 1], [], []>} : vector<256x128xbf16>, vector<128x64xbf16>, vector<256x64xf32> -> vector<256x64xf32>
    %c0_15 = arith.constant 0 : index
    %c0_16 = arith.constant 0 : index
    %19 = vector.load %arg7[%c0_15, %c0_16] : memref<1x64xf32, #tpu.memory_space<vmem>>, vector<1x64xf32>
    %20 = vector.broadcast %19 : vector<1x64xf32> to vector<256x64xf32>
    %21 = arith.addf %18, %20 : vector<256x64xf32>
    %cst_17 = arith.constant 0.000000e+00 : f32
    %22 = vector.broadcast %cst_17 : f32 to vector<256x64xf32>
    %23 = arith.maximumf %21, %22 : vector<256x64xf32>
    %24 = arith.truncf %23 : vector<256x64xf32> to vector<256x64xbf16>
    %c0_18 = arith.constant 0 : index
    %c0_19 = arith.constant 0 : index
    %25 = vector.load %arg8[%c0_18, %c0_19] : memref<64x10xbf16, #tpu.memory_space<vmem>>, vector<64x10xbf16>
    %cst_20 = arith.constant dense<0.000000e+00> : vector<256x10xf32>
    %26 = tpu.matmul %24, %25, %cst_20 {dimension_numbers = #tpu.dot_dimension_numbers<[1], [0], [0], [1], [0, 0, 1, 1], [], []>} : vector<256x64xbf16>, vector<64x10xbf16>, vector<256x10xf32> -> vector<256x10xf32>
    %c0_21 = arith.constant 0 : index
    %c0_22 = arith.constant 0 : index
    %27 = vector.load %arg9[%c0_21, %c0_22] : memref<1x10xf32, #tpu.memory_space<vmem>>, vector<1x10xf32>
    %28 = vector.broadcast %27 : vector<1x10xf32> to vector<256x10xf32>
    %29 = arith.addf %26, %28 : vector<256x10xf32>
    %cst_23 = arith.constant dense<0xFF800000> : vector<256xf32>
    %30 = vector.multi_reduction <maximumf>, %29, %cst_23 [1] : vector<256x10xf32> to vector<256xf32>
    %31 = vector.shape_cast %30 : vector<256xf32> to vector<256x1xf32>
    %32 = vector.broadcast %31 : vector<256x1xf32> to vector<256x10xf32>
    %33 = arith.subf %29, %32 : vector<256x10xf32>
    %34 = math.exp %33 : vector<256x10xf32>
    %cst_24 = arith.constant dense<0.000000e+00> : vector<256xf32>
    %35 = vector.multi_reduction <add>, %34, %cst_24 [1] : vector<256x10xf32> to vector<256xf32>
    %36 = vector.shape_cast %35 : vector<256xf32> to vector<256x1xf32>
    %37 = math.log %36 : vector<256x1xf32>
    %38 = vector.broadcast %37 : vector<256x1xf32> to vector<256x10xf32>
    %39 = arith.subf %33, %38 : vector<256x10xf32>
    %c0_25 = arith.constant 0 : index
    %c0_26 = arith.constant 0 : index
    %40 = vector.load %arg10[%c0_25, %c0_26] : memref<256x10xf32, #tpu.memory_space<vmem>>, vector<256x10xf32>
    tpu.vector_store %arg10[%c0_25, %c0_26], %39 {strides = array<i32>} : memref<256x10xf32, #tpu.memory_space<vmem>>, vector<256x10xf32>,
    return
  }
  func.func @transform_0(%arg0: i32) -> (i32, i32) {
    %c0_i32 = arith.constant 0 : i32
    %c0_i32_0 = arith.constant 0 : i32
    return %arg0, %c0_i32 : i32, i32
  }
  func.func @transform_1(%arg0: i32) -> (i32, i32) {
    %c0_i32 = arith.constant 0 : i32
    %c0_i32_0 = arith.constant 0 : i32
    %c0_i32_1 = arith.constant 0 : i32
    return %c0_i32, %c0_i32_0 : i32, i32
  }
  func.func @transform_2(%arg0: i32) -> (i32, i32) {
    %c0_i32 = arith.constant 0 : i32
    %c0_i32_0 = arith.constant 0 : i32
    %c0_i32_1 = arith.constant 0 : i32
    return %c0_i32, %c0_i32_0 : i32, i32
  }
  func.func @transform_3(%arg0: i32) -> (i32, i32) {
    %c0_i32 = arith.constant 0 : i32
    %c0_i32_0 = arith.constant 0 : i32
    %c0_i32_1 = arith.constant 0 : i32
    return %c0_i32, %c0_i32_0 : i32, i32
  }
  func.func @transform_4(%arg0: i32) -> (i32, i32) {
    %c0_i32 = arith.constant 0 : i32
    %c0_i32_0 = arith.constant 0 : i32
    %c0_i32_1 = arith.constant 0 : i32
    return %c0_i32, %c0_i32_0 : i32, i32
  }
  func.func @transform_5(%arg0: i32) -> (i32, i32) {
    %c0_i32 = arith.constant 0 : i32
    %c0_i32_0 = arith.constant 0 : i32
    %c0_i32_1 = arith.constant 0 : i32
    return %c0_i32, %c0_i32_0 : i32, i32
  }
  func.func @transform_6(%arg0: i32) -> (i32, i32) {
    %c0_i32 = arith.constant 0 : i32
    %c0_i32_0 = arith.constant 0 : i32
    %c0_i32_1 = arith.constant 0 : i32
    return %c0_i32, %c0_i32_0 : i32, i32
  }
  func.func @transform_7(%arg0: i32) -> (i32, i32) {
    %c0_i32 = arith.constant 0 : i32
    %c0_i32_0 = arith.constant 0 : i32
    %c0_i32_1 = arith.constant 0 : i32
    return %c0_i32, %c0_i32_0 : i32, i32
  }
  func.func @transform_8(%arg0: i32) -> (i32, i32) {
    %c0_i32 = arith.constant 0 : i32
    %c0_i32_0 = arith.constant 0 : i32
    %c0_i32_1 = arith.constant 0 : i32
    return %c0_i32, %c0_i32_0 : i32, i32
  }
  func.func @transform_9(%arg0: i32) -> (i32, i32) {
    %c0_i32 = arith.constant 0 : i32
    %c0_i32_0 = arith.constant 0 : i32
    return %arg0, %c0_i32 : i32, i32
  }
}

</mosaic_0001>

<bundles_post_ra>
// kernel: tpu_custom_call.1
= control target key start
LH: loop header
LB: loop body
LE: loop exit
PB: predicated region body
PF: predicated region fallthrough
CT: control target
= control target key end

     0   :  { %vm1321_vm0 = vcmask 130048   ;;  %vm2901_vm1 = vcmask 523264   ;;  %vm3111_vm2 = vcmask 80896   ;;  %s6404_s1 = inlined_call_operand.vmem [shape: bf16[784,256], index: 1, kind: input, shape index: {}]   ;;  %s6405_s0 = inlined_call_operand.vmem [shape: bf16[256,784], index: 0, kind: input, shape index: {}]   ;;  %s6406_s3 = inlined_call_operand.vmem [shape: bf16[256,128], index: 3, kind: input, shape index: {}]   ;;  %s6407_s2 = inlined_call_operand.vmem [shape: f32[1,256], index: 2, kind: input, shape index: {}]   ;;  %s6408_s5 = inlined_call_operand.vmem [shape: bf16[128,64], index: 5, kind: input, shape index: {}]   ;;  %s6409_s4 = inlined_call_operand.vmem [shape: f32[1,128], index: 4, kind: input, shape index: {}]   ;;  %s6410_s7 = inlined_call_operand.vmem [shape: bf16[64,10], index: 7, kind: input, shape index: {}]   ;;  %s6411_s6 = inlined_call_operand.vmem [shape: f32[1,64], index: 6, kind: input, shape index: {}]   ;;  %s6412_s8 = inlined_call_operand.vmem [shape: f32[1,10], index: 8, kind: input, shape index: {}]   ;;  %s6413_s9 = inlined_call_operand.vmem [shape: f32[256,10], index: 9, kind: output, shape index: {}]  }
   0x1   :  { %v4306_v0 = vld [vmem:[%s6404_s1 + $0x104] ss:$8 sps:$4 sm:$0xff]   ;;  %v4308_v1 = vld [vmem:[%s6404_s1 + $0x100] ss:$8 sps:$4 sm:$0xff]   ;;  %v4309_v2 = vld [vmem:[%s6404_s1 + $0x114] ss:$8 sps:$4 sm:$0xff]  }
   0x2   :  { %1563 = vmatprep.subr.bf16.mxu0 %v4306_v0  ;;  %v4311_v3 = vld [vmem:[%s6404_s1 + $0x110] ss:$8 sps:$4 sm:$0xff]   ;;  %v4312_v4 = vld [vmem:[%s6404_s1 + $0x124] ss:$8 sps:$4 sm:$0xff]   ;;  %v4314_v5 = vld [vmem:[%s6404_s1 + $0x120] ss:$8 sps:$4 sm:$0xff]  }
   0x3   :  { %1564 = vmatpush1.bf16.msra.mxu0 %v4308_v1  ;;  %v4315_v6 = vld [vmem:[%s6404_s1 + $0x134] ss:$8 sps:$4 sm:$0xff]   ;;  %v4317_v7 = vld [vmem:[%s6404_s1 + $0x130] ss:$8 sps:$4 sm:$0xff]   ;;  %v4318_v8 = vld [vmem:[%s6404_s1 + $0x144] ss:$8 sps:$4 sm:$0xff]  }
   0x4   :  { %1565 = vmatprep.subr.bf16.mxu0 %v4309_v2  ;;  %v4320_v9 = vld [vmem:[%s6404_s1 + $0x140] ss:$8 sps:$4 sm:$0xff]   ;;  %v4321_v10 = vld [vmem:[%s6404_s1 + $0x154] ss:$8 sps:$4 sm:$0xff]   ;;  %v4323_v11 = vld [vmem:[%s6404_s1 + $0x150] ss:$8 sps:$4 sm:$0xff]  }
   0x5   :  { %v4324_v12 = vld [vmem:[%s6404_s1 + $0x164] ss:$8 sps:$4 sm:$0xff]   ;;  %v4326_v14 = vld [vmem:[%s6404_s1 + $0x160] ss:$8 sps:$4 sm:$0xff]   ;;  %v4327_v15 = vld [vmem:[%s6404_s1 + $0x174] ss:$8 sps:$4 sm:$0xff]  }
   0x6   :  { %v4356_v13 = vld [vmem:[%s6405_s0 + $0xc] ss:$28 sps:$4 sm:$0xff]   ;;  %v4329_v16 = vld [vmem:[%s6404_s1 + $0x170] ss:$8 sps:$4 sm:$0xff]   ;;  %v4333_v19 = vld [vmem:[%s6404_s1 + $0x194] ss:$8 sps:$4 sm:$0xff]  }
   0x7   :  { %1566 = vmatpush1.bf16.msra.mxu0 %v4311_v3  ;;  %1595 = vmatprep.mubr.bf16.mxu0 %v4356_v13  ;;  %v4330_v17 = vld [vmem:[%s6404_s1 + $0x184] ss:$8 sps:$4 sm:$0xff]   ;;  %v4332_v18 = vld [vmem:[%s6404_s1 + $0x180] ss:$8 sps:$4 sm:$0xff]   ;;  %v4335_v20 = vld [vmem:[%s6404_s1 + $0x190] ss:$8 sps:$4 sm:$0xff]  }
   0x8   :  { %1567 = vmatprep.subr.bf16.mxu0 %v4312_v4  ;;  %v4336_v21 = vld [vmem:[%s6404_s1 + $0x1a4] ss:$8 sps:$4 sm:$0xff]   ;;  %v4338_v22 = vld [vmem:[%s6404_s1 + $0x1a0] ss:$8 sps:$4 sm:$0xff]   ;;  %v4339_v23 = vld [vmem:[%s6404_s1 + $0x1b4] ss:$8 sps:$4 sm:$0xff]  }
   0x9   :  { %v4341_v24 = vld [vmem:[%s6404_s1 + $0x1b0] ss:$8 sps:$4 sm:$0xff]   ;;  %v4342_v25 = vld [vmem:[%s6404_s1 + $0x1c4] ss:$8 sps:$4 sm:$0xff]   ;;  %v4344_v26 = vld [vmem:[%s6404_s1 + $0x1c0] ss:$8 sps:$4 sm:$0xff]  }
   0xa   :  { %v4345_v27 = vld [vmem:[%s6404_s1 + $0x1d4] ss:$8 sps:$4 sm:$0xff]   ;;  %v4347_v28 = vld [vmem:[%s6404_s1 + $0x1d0] ss:$8 sps:$4 sm:$0xff]   ;;  %v4348_v29 = vld [vmem:[%s6404_s1 + $0x1e4] ss:$8 sps:$4 sm:$0xff]  }
   0xb   :  { %1568 = vmatpush1.bf16.msra.mxu0 %v4314_v5  ;;  %v4350_v30 = vld [vmem:[%s6404_s1 + $0x1e0] ss:$8 sps:$4 sm:$0xff]   ;;  %v4351_v31 = vld [vmem:[%s6404_s1 + $0x1f4] ss:$8 sps:$4 sm:$0xff]   ;;  %v4353_v32 = vld [vmem:[%s6404_s1 + $0x1f0] ss:$8 sps:$4 sm:$0xff]  }
   0xc   :  { %1569 = vmatprep.subr.bf16.mxu0 %v4315_v6  ;;  %v4359_v33 = vld [vmem:[%s6404_s1 + $0x204] ss:$8 sps:$4 sm:$0xff]   ;;  %v4357_v35 = vld [vmem:[%s6404_s1 + $0x200] ss:$8 sps:$4 sm:$0xff]   ;;  %v4365_v37 = vld [vmem:[%s6404_s1 + $0x214] ss:$8 sps:$4 sm:$0xff]  }
   0xd   :  { %v4354_v34 = vld [vmem:[%s6405_s0 + $0x8] ss:$28 sps:$4 sm:$0xff]   ;;  %v4363_v38 = vld [vmem:[%s6404_s1 + $0x210] ss:$8 sps:$4 sm:$0xff]   ;;  %v4362_v40 = vld [vmem:[%s6405_s0 + $0x40] ss:$28 sps:$4 sm:$0xff]  }
   0xe   :  { %v4360_v36 = vld [vmem:[%s6405_s0 + $0x44] ss:$28 sps:$4 sm:$0xff]   ;;  %v4366_v41 = vld [vmem:[%s6405_s0 + $0x7c] ss:$28 sps:$4 sm:$0xff]   ;;  %v4372_v47 = vld [vmem:[%s6405_s0 + $0xb4] ss:$28 sps:$4 sm:$0xff]  }
   0xf   :  { %1570 = vmatpush1.bf16.msra.mxu0 %v4317_v7  ;;  %v4371_v39 = vld [vmem:[%s6404_s1 + $0x224] ss:$8 sps:$4 sm:$0xff]   ;;  %v4369_v42 = vld [vmem:[%s6404_s1 + $0x220] ss:$8 sps:$4 sm:$0xff]   ;;  %v4377_v43 = vld [vmem:[%s6404_s1 + $0x234] ss:$8 sps:$4 sm:$0xff]  }
  0x10   :  { %1571 = vmatprep.subr.bf16.mxu0 %v4318_v8  ;;  %v4375_v44 = vld [vmem:[%s6404_s1 + $0x230] ss:$8 sps:$4 sm:$0xff]   ;;  %v4383_v45 = vld [vmem:[%s6404_s1 + $0x244] ss:$8 sps:$4 sm:$0xff]   ;;  %v4381_v48 = vld [vmem:[%s6404_s1 + $0x240] ss:$8 sps:$4 sm:$0xff]  }
  0x11   :  { %v4368_v46 = vld [vmem:[%s6405_s0 + $0x78] ss:$28 sps:$4 sm:$0xff]   ;;  %v4395_v51 = vld [vmem:[%s6404_s1 + $0x264] ss:$8 sps:$4 sm:$0xff]   ;;  %v4393_v54 = vld [vmem:[%s6404_s1 + $0x260] ss:$8 sps:$4 sm:$0xff]  }
  0x12   :  { %v4389_v49 = vld [vmem:[%s6404_s1 + $0x254] ss:$8 sps:$4 sm:$0xff]   ;;  %v4387_v50 = vld [vmem:[%s6404_s1 + $0x250] ss:$8 sps:$4 sm:$0xff]   ;;  %v4378_v53 = vld [vmem:[%s6405_s0 + $0xec] ss:$28 sps:$4 sm:$0xff]  }
  0x13   :  { %1572 = vmatpush1.bf16.msra.mxu0 %v4320_v9  ;;  %v4374_v52 = vld [vmem:[%s6405_s0 + $0xb0] ss:$28 sps:$4 sm:$0xff]   ;;  %v4401_v55 = vld [vmem:[%s6404_s1 + $0x274] ss:$8 sps:$4 sm:$0xff]   ;;  %v4380_v58 = vld [vmem:[%s6405_s0 + $0xe8] ss:$28 sps:$4 sm:$0xff]  }
  0x14   :  { %1573 = vmatprep.subr.bf16.mxu0 %v4321_v10  ;;  %v4399_v56 = vld [vmem:[%s6404_s1 + $0x270] ss:$8 sps:$4 sm:$0xff]   ;;  %v4407_v57 = vld [vmem:[%s6404_s1 + $0x284] ss:$8 sps:$4 sm:$0xff]   ;;  %v4405_v60 = vld [vmem:[%s6404_s1 + $0x280] ss:$8 sps:$4 sm:$0xff]  }
  0x15   :  { %v4384_v59 = vld [vmem:[%s6405_s0 + $0x124] ss:$28 sps:$4 sm:$0xff]   ;;  %v4413_v61 = vld [vmem:[%s6404_s1 + $0x294] ss:$8 sps:$4 sm:$0xff]   ;;  %v4411_v62 = vld [vmem:[%s6404_s1 + $0x290] ss:$8 sps:$4 sm:$0xff]  }
  0x16   :  { %v4419_v63 = vld [vmem:[%s6404_s1 + $0x2a4] ss:$8 sps:$4 sm:$0xff]   ;;  %v4386_v0 = vld [vmem:[%s6405_s0 + $0x120] ss:$28 sps:$4 sm:$0xff]   ;;  %v4423_v4 = vld [vmem:[%s6404_s1 + $0x2b0] ss:$8 sps:$4 sm:$0xff]  }
  0x17   :  { %1574 = vmatpush1.bf16.msra.mxu0 %v4323_v11  ;;  %v4390_v1 = vld [vmem:[%s6405_s0 + $0x15c] ss:$28 sps:$4 sm:$0xff]   ;;  %v4417_v2 = vld [vmem:[%s6404_s1 + $0x2a0] ss:$8 sps:$4 sm:$0xff]   ;;  %v4431_v5 = vld [vmem:[%s6404_s1 + $0x2c4] ss:$8 sps:$4 sm:$0xff]  }
  0x18   :  { %1575 = vmatprep.subr.bf16.mxu0 %v4324_v12  ;;  %v4425_v3 = vld [vmem:[%s6404_s1 + $0x2b4] ss:$8 sps:$4 sm:$0xff]   ;;  %v4429_v8 = vld [vmem:[%s6404_s1 + $0x2c0] ss:$8 sps:$4 sm:$0xff]   ;;  %v4435_v10 = vld [vmem:[%s6404_s1 + $0x2d0] ss:$8 sps:$4 sm:$0xff]  }
  0x19   :  { %v4392_v6 = vld [vmem:[%s6405_s0 + $0x158] ss:$28 sps:$4 sm:$0xff]   ;;  %v4443_v11 = vld [vmem:[%s6404_s1 + $0x2e4] ss:$8 sps:$4 sm:$0xff]  }
  0x1a   :  { %v4396_v7 = vld [vmem:[%s6405_s0 + $0x194] ss:$28 sps:$4 sm:$0xff]   ;;  %v4402_v13 = vld [vmem:[%s6405_s0 + $0x1cc] ss:$28 sps:$4 sm:$0xff]  }
  0x1b   :  { %1576 = vmatpush1.bf16.msra.mxu0 %v4326_v14  ;;  %v4437_v9 = vld [vmem:[%s6404_s1 + $0x2d4] ss:$8 sps:$4 sm:$0xff]   ;;  %v4398_v12 = vld [vmem:[%s6405_s0 + $0x190] ss:$28 sps:$4 sm:$0xff]   ;;  %v4441_v14 = vld [vmem:[%s6404_s1 + $0x2e0] ss:$8 sps:$4 sm:$0xff]  }
  0x1c   :  { %1577 = vmatprep.subr.bf16.mxu0 %v4327_v15  ;;  %v4449_v15 = vld [vmem:[%s6404_s1 + $0x2f4] ss:$8 sps:$4 sm:$0xff]  }
  0x1f   :  { %1578 = vmatpush1.bf16.msra.mxu0 %v4329_v16  ;;  %v4477_v16 = vld [vmem:[%s6404_s1 + $0x4] ss:$8 sps:$4 sm:$0xff]  }
  0x20   :  { %1579 = vmatprep.subr.bf16.mxu0 %v4330_v17  ;;  %v4479_v17 = vld [vmem:[%s6404_s1] ss:$8 sps:$4 sm:$0xff]   ;;  %1370 = vmatprep.subr.bf16.mxu1 %v4477_v16 }
  0x21   :  { %1371 = vmatpush1.bf16.msra.mxu1 %v4479_v17  ;;  %v4563_v16 = vld [vmem:[%s6405_s0 + $0xa8] ss:$28 sps:$4 sm:$0xff]   ;;  %v4464_v17 = vld [vmem:[%s6405_s0 + $0xb8] ss:$28 sps:$4 sm:$0xff]  }
  0x23   :  { %1580 = vmatpush1.bf16.msra.mxu0 %v4332_v18  ;;  %v4447_v18 = vld [vmem:[%s6404_s1 + $0x2f0] ss:$8 sps:$4 sm:$0xff]  }
  0x24   :  { %1581 = vmatprep.subr.bf16.mxu0 %v4333_v19  ;;  %v4482_v19 = vld [vmem:[%s6404_s1 + $0x14] ss:$8 sps:$4 sm:$0xff]  }
  0x25   :  { %1372 = vmatprep.subr.bf16.mxu1 %v4482_v19  ;;  %v4565_v19 = vld [vmem:[%s6405_s0 + $0xe4] ss:$28 sps:$4 sm:$0xff]  }
  0x27   :  { %1582 = vmatpush1.bf16.msra.mxu0 %v4335_v20  ;;  %v4455_v20 = vld [vmem:[%s6404_s1 + $0x304] ss:$8 sps:$4 sm:$0xff]  }
  0x28   :  { %1583 = vmatprep.subr.bf16.mxu0 %v4336_v21  ;;  %v4404_v21 = vld [vmem:[%s6405_s0 + $0x1c8] ss:$28 sps:$4 sm:$0xff]  }
  0x2b   :  { %1584 = vmatpush1.bf16.msra.mxu0 %v4338_v22  ;;  %v4408_v22 = vld [vmem:[%s6405_s0 + $0x204] ss:$28 sps:$4 sm:$0xff]  }
  0x2c   :  { %1585 = vmatprep.subr.bf16.mxu0 %v4339_v23  ;;  %v4485_v23 = vld [vmem:[%s6404_s1 + $0x10] ss:$8 sps:$4 sm:$0xff]  }
  0x2d   :  { %1373 = vmatpush1.bf16.msra.mxu1 %v4485_v23  ;;  %v4569_v23 = vld [vmem:[%s6405_s0 + $0x11c] ss:$28 sps:$4 sm:$0xff]  }
  0x2f   :  { %1586 = vmatpush1.bf16.msra.mxu0 %v4341_v24  ;;  %v4486_v24 = vld [vmem:[%s6404_s1 + $0x24] ss:$8 sps:$4 sm:$0xff]  }
  0x30   :  { %1587 = vmatprep.subr.bf16.mxu0 %v4342_v25  ;;  %v4488_v25 = vld [vmem:[%s6404_s1 + $0x20] ss:$8 sps:$4 sm:$0xff]   ;;  %1374 = vmatprep.subr.bf16.mxu1 %v4486_v24  ;;  %v4571_v24 = vld [vmem:[%s6405_s0 + $0x118] ss:$28 sps:$4 sm:$0xff]  }
  0x31   :  { %1375 = vmatpush1.bf16.msra.mxu1 %v4488_v25  ;;  %v4470_v25 = vld [vmem:[%s6405_s0 + $0x128] ss:$28 sps:$4 sm:$0xff]  }
  0x33   :  { %1588 = vmatpush1.bf16.msra.mxu0 %v4344_v26  ;;  %v4491_v26 = vld [vmem:[%s6404_s1 + $0x34] ss:$8 sps:$4 sm:$0xff]  }
  0x34   :  { %1589 = vmatprep.subr.bf16.mxu0 %v4345_v27  ;;  %v4410_v27 = vld [vmem:[%s6405_s0 + $0x200] ss:$28 sps:$4 sm:$0xff]   ;;  %1376 = vmatprep.subr.bf16.mxu1 %v4491_v26 }
  0x35   :  { %v4471_v26 = vld [vmem:[%s6405_s0 + $0x164] ss:$28 sps:$4 sm:$0xff]  }
  0x37   :  { %1590 = vmatpush1.bf16.msra.mxu0 %v4347_v28  ;;  %v4414_v28 = vld [vmem:[%s6405_s0 + $0x23c] ss:$28 sps:$4 sm:$0xff]  }
  0x38   :  { %1591 = vmatprep.subr.bf16.mxu0 %v4348_v29  ;;  %v4494_v29 = vld [vmem:[%s6404_s1 + $0x30] ss:$8 sps:$4 sm:$0xff]  }
  0x39   :  { %1377 = vmatpush1.bf16.msra.mxu1 %v4494_v29  ;;  %v4473_v29 = vld [vmem:[%s6405_s0 + $0x160] ss:$28 sps:$4 sm:$0xff]  }
  0x3b   :  { %1592 = vmatpush1.bf16.msra.mxu0 %v4350_v30  ;;  %v4495_v30 = vld [vmem:[%s6404_s1 + $0x44] ss:$8 sps:$4 sm:$0xff]  }
  0x3c   :  { %1593 = vmatprep.subr.bf16.mxu0 %v4351_v31  ;;  %v4497_v31 = vld [vmem:[%s6404_s1 + $0x40] ss:$8 sps:$4 sm:$0xff]   ;;  %1378 = vmatprep.subr.bf16.mxu1 %v4495_v30  ;;  %v4474_v30 = vld [vmem:[%s6405_s0 + $0x19c] ss:$28 sps:$4 sm:$0xff]  }
  0x3d   :  { %1379 = vmatpush1.bf16.msra.mxu1 %v4497_v31  ;;  %v4577_v31 = vld [vmem:[%s6405_s0 + $0x18c] ss:$28 sps:$4 sm:$0xff]  }
  0x3f   :  { %1594 = vmatpush1.bf16.msra.mxu0 %v4353_v32  ;;  %v4500_v32 = vld [vmem:[%s6404_s1 + $0x54] ss:$8 sps:$4 sm:$0xff]  }
  0x40   :  { %1756 = vmatprep.subr.bf16.mxu0 %v4359_v33  ;;  %v4416_v33 = vld [vmem:[%s6405_s0 + $0x238] ss:$28 sps:$4 sm:$0xff]   ;;  %1380 = vmatprep.subr.bf16.mxu1 %v4500_v32  ;;  %v4579_v32 = vld [vmem:[%s6405_s0 + $0x188] ss:$28 sps:$4 sm:$0xff]  }
  0x42   :  { %1596 = vmatmul.mubr.bf16.vlgmr.msra.gmra.mrb[0].mxu0 %v4354_v34  ;;  %v4420_v34 = vld [vmem:[%s6405_s0 + $0x274] ss:$28 sps:$4 sm:$0xff]  }
  0x43   :  { %1757 = vmatpush1.bf16.msra.mxu0 %v4357_v35  ;;  %1605 = vmatprep.mubr.bf16.mxu0 %v4360_v36  ;;  %v4503_v35 = vld [vmem:[%s6404_s1 + $0x50] ss:$8 sps:$4 sm:$0xff]   ;;  %v4504_v36 = vld [vmem:[%s6404_s1 + $0x64] ss:$8 sps:$4 sm:$0xff]  }
  0x44   :  { %1758 = vmatprep.subr.bf16.mxu0 %v4365_v37  ;;  %1381 = vmatpush1.bf16.msra.mxu1 %v4503_v35  ;;  %v4506_v37 = vld [vmem:[%s6404_s1 + $0x60] ss:$8 sps:$4 sm:$0xff]  }
  0x45   :  { %1382 = vmatprep.subr.bf16.mxu1 %v4504_v36  ;;  %v4581_v35 = vld [vmem:[%s6405_s0 + $0x1c4] ss:$28 sps:$4 sm:$0xff]  }
  0x46   :  { %v4583_v36 = vld [vmem:[%s6405_s0 + $0x1c0] ss:$28 sps:$4 sm:$0xff]  }
  0x47   :  { %1759 = vmatpush1.bf16.msra.mxu0 %v4363_v38  ;;  %v4509_v38 = vld [vmem:[%s6404_s1 + $0x74] ss:$8 sps:$4 sm:$0xff]  }
  0x48   :  { %1760 = vmatprep.subr.bf16.mxu0 %v4371_v39  ;;  %v4422_v39 = vld [vmem:[%s6405_s0 + $0x270] ss:$28 sps:$4 sm:$0xff]   ;;  %1383 = vmatpush1.bf16.msra.mxu1 %v4506_v37 }
  0x49   :  { %1384 = vmatprep.subr.bf16.mxu1 %v4509_v38  ;;  %v4484_v37 = vld [vmem:[%s6405_s0 + $0x1d0] ss:$28 sps:$4 sm:$0xff]  }
  0x4a   :  { %1606 = vmatmul.mubr.bf16.gmra.mrb[4].mxu0 %v4362_v40  ;;  %v4426_v40 = vld [vmem:[%s6405_s0 + $0x2ac] ss:$28 sps:$4 sm:$0xff]  }
  0x4b   :  { %1615 = vmatprep.mubr.bf16.mxu0 %v4366_v41  ;;  %1761 = vmatpush1.bf16.msra.mxu0 %v4369_v42  ;;  %v4512_v41 = vld [vmem:[%s6404_s1 + $0x70] ss:$8 sps:$4 sm:$0xff]   ;;  %v4513_v42 = vld [vmem:[%s6404_s1 + $0x84] ss:$8 sps:$4 sm:$0xff]  }
  0x4c   :  { %1762 = vmatprep.subr.bf16.mxu0 %v4377_v43  ;;  %1385 = vmatpush1.bf16.msra.mxu1 %v4512_v41  ;;  %v4515_v43 = vld [vmem:[%s6404_s1 + $0x80] ss:$8 sps:$4 sm:$0xff]  }
  0x4d   :  { %1386 = vmatprep.subr.bf16.mxu1 %v4513_v42  ;;  %v4489_v38 = vld [vmem:[%s6405_s0 + $0x20c] ss:$28 sps:$4 sm:$0xff]   ;;  %v4498_v42 = vld [vmem:[%s6405_s0 + $0x244] ss:$28 sps:$4 sm:$0xff]  }
  0x4e   :  { %v4493_v41 = vld [vmem:[%s6405_s0 + $0x208] ss:$28 sps:$4 sm:$0xff]  }
  0x4f   :  { %1763 = vmatpush1.bf16.msra.mxu0 %v4375_v44  ;;  %v4518_v44 = vld [vmem:[%s6404_s1 + $0x94] ss:$8 sps:$4 sm:$0xff]  }
  0x50   :  { %1764 = vmatprep.subr.bf16.mxu0 %v4383_v45  ;;  %v4428_v45 = vld [vmem:[%s6405_s0 + $0x2a8] ss:$28 sps:$4 sm:$0xff]   ;;  %1387 = vmatpush1.bf16.msra.mxu1 %v4515_v43  ;;  %v4589_v43 = vld [vmem:[%s6405_s0 + $0x234] ss:$28 sps:$4 sm:$0xff]  }
  0x51   :  { %1388 = vmatprep.subr.bf16.mxu1 %v4518_v44  ;;  %v4591_v44 = vld [vmem:[%s6405_s0 + $0x230] ss:$28 sps:$4 sm:$0xff]  }
  0x52   :  { %1616 = vmatmul.mubr.bf16.gmra.mrb[8].mxu0 %v4368_v46  ;;  %v4432_v46 = vld [vmem:[%s6405_s0 + $0x2e4] ss:$28 sps:$4 sm:$0xff]  }
  0x53   :  { %1625 = vmatprep.mubr.bf16.mxu0 %v4372_v47  ;;  %1765 = vmatpush1.bf16.msra.mxu0 %v4381_v48  ;;  %v4521_v47 = vld [vmem:[%s6404_s1 + $0x90] ss:$8 sps:$4 sm:$0xff]   ;;  %v4522_v48 = vld [vmem:[%s6404_s1 + $0xa4] ss:$8 sps:$4 sm:$0xff]  }
  0x54   :  { %1766 = vmatprep.subr.bf16.mxu0 %v4389_v49  ;;  %1389 = vmatpush1.bf16.msra.mxu1 %v4521_v47  ;;  %v4524_v49 = vld [vmem:[%s6404_s1 + $0xa0] ss:$8 sps:$4 sm:$0xff]  }
  0x55   :  { %1390 = vmatprep.subr.bf16.mxu1 %v4522_v48  ;;  %v4593_v47 = vld [vmem:[%s6405_s0 + $0x26c] ss:$28 sps:$4 sm:$0xff]  }
  0x56   :  { %v4595_v48 = vld [vmem:[%s6405_s0 + $0x268] ss:$28 sps:$4 sm:$0xff]  }
  0x57   :  { %1767 = vmatpush1.bf16.msra.mxu0 %v4387_v50  ;;  %v4527_v50 = vld [vmem:[%s6404_s1 + $0xb4] ss:$8 sps:$4 sm:$0xff]  }
  0x58   :  { %1768 = vmatprep.subr.bf16.mxu0 %v4395_v51  ;;  %v4434_v51 = vld [vmem:[%s6405_s0 + $0x2e0] ss:$28 sps:$4 sm:$0xff]   ;;  %1391 = vmatpush1.bf16.msra.mxu1 %v4524_v49  ;;  %v4511_v49 = vld [vmem:[%s6405_s0 + $0x278] ss:$28 sps:$4 sm:$0xff]  }
  0x59   :  { %1392 = vmatprep.subr.bf16.mxu1 %v4527_v50  ;;  %v4516_v50 = vld [vmem:[%s6405_s0 + $0x2b4] ss:$28 sps:$4 sm:$0xff]  }
  0x5a   :  { %1626 = vmatmul.mubr.bf16.gmra.mrb[12].mxu0 %v4374_v52  ;;  %v4438_v52 = vld [vmem:[%s6405_s0 + $0x31c] ss:$28 sps:$4 sm:$0xff]  }
  0x5b   :  { %1635 = vmatprep.mubr.bf16.mxu0 %v4378_v53  ;;  %1769 = vmatpush1.bf16.msra.mxu0 %v4393_v54  ;;  %v4530_v53 = vld [vmem:[%s6404_s1 + $0xb0] ss:$8 sps:$4 sm:$0xff]   ;;  %v4531_v54 = vld [vmem:[%s6404_s1 + $0xc4] ss:$8 sps:$4 sm:$0xff]  }
  0x5c   :  { %1770 = vmatprep.subr.bf16.mxu0 %v4401_v55  ;;  %1393 = vmatpush1.bf16.msra.mxu1 %v4530_v53  ;;  %v4533_v55 = vld [vmem:[%s6404_s1 + $0xc0] ss:$8 sps:$4 sm:$0xff]  }
  0x5d   :  { %1394 = vmatprep.subr.bf16.mxu1 %v4531_v54  ;;  %v4600_v53 = vld [vmem:[%s6406_s3 + $0x40] sm:$0xff]   ;;  %v4520_v54 = vld [vmem:[%s6405_s0 + $0x2b0] ss:$28 sps:$4 sm:$0xff]  }
  0x5f   :  { %1771 = vmatpush1.bf16.msra.mxu0 %v4399_v56  ;;  %v4536_v56 = vld [vmem:[%s6404_s1 + $0xd4] ss:$8 sps:$4 sm:$0xff]  }
  0x60   :  { %1772 = vmatprep.subr.bf16.mxu0 %v4407_v57  ;;  %v4440_v57 = vld [vmem:[%s6405_s0 + $0x318] ss:$28 sps:$4 sm:$0xff]   ;;  %1395 = vmatpush1.bf16.msra.mxu1 %v4533_v55  ;;  %v4601_v55 = vld [vmem:[%s6406_s3] sm:$0xff]  }
  0x61   :  { %1396 = vmatprep.subr.bf16.mxu1 %v4536_v56  ;;  %v4525_v56 = vld [vmem:[%s6405_s0 + $0x2ec] ss:$28 sps:$4 sm:$0xff]  }
  0x62   :  { %1636 = vmatmul.mubr.bf16.gmra.mrb[16].mxu0 %v4380_v58  ;;  %v4444_v58 = vld [vmem:[%s6405_s0 + $0x354] ss:$28 sps:$4 sm:$0xff]  }
  0x63   :  { %1645 = vmatprep.mubr.bf16.mxu0 %v4384_v59  ;;  %1773 = vmatpush1.bf16.msra.mxu0 %v4405_v60  ;;  %v4539_v59 = vld [vmem:[%s6404_s1 + $0xd0] ss:$8 sps:$4 sm:$0xff]   ;;  %v4540_v60 = vld [vmem:[%s6404_s1 + $0xe4] ss:$8 sps:$4 sm:$0xff]  }
  0x64   :  { %1774 = vmatprep.subr.bf16.mxu0 %v4413_v61  ;;  %1397 = vmatpush1.bf16.msra.mxu1 %v4539_v59  ;;  %v4542_v61 = vld [vmem:[%s6404_s1 + $0xe0] ss:$8 sps:$4 sm:$0xff]  }
  0x65   :  { %1398 = vmatprep.subr.bf16.mxu1 %v4540_v60  ;;  %v4529_v59 = vld [vmem:[%s6405_s0 + $0x2e8] ss:$28 sps:$4 sm:$0xff]  }
  0x66   :  { %v4534_v60 = vld [vmem:[%s6405_s0 + $0x324] ss:$28 sps:$4 sm:$0xff]  }
  0x67   :  { %1775 = vmatpush1.bf16.msra.mxu0 %v4411_v62  ;;  %v4545_v62 = vld [vmem:[%s6404_s1 + $0xf4] ss:$8 sps:$4 sm:$0xff]  }
  0x68   :  { %1776 = vmatprep.subr.bf16.mxu0 %v4419_v63  ;;  %v4446_v63 = vld [vmem:[%s6405_s0 + $0x350] ss:$28 sps:$4 sm:$0xff]   ;;  %1399 = vmatpush1.bf16.msra.mxu1 %v4542_v61 }
  0x69   :  { %1400 = vmatprep.subr.bf16.mxu1 %v4545_v62  ;;  %v4607_v61 = vld [vmem:[%s6405_s0 + $0x314] ss:$28 sps:$4 sm:$0xff]  }
  0x6a   :  { %1646 = vmatmul.mubr.bf16.gmra.mrb[20].mxu0 %v4386_v0  ;;  %v4452_v0 = vld [vmem:[%s6405_s0 + $0x14] ss:$28 sps:$4 sm:$0xff]  }
  0x6b   :  { %1655 = vmatprep.mubr.bf16.mxu0 %v4390_v1  ;;  %1777 = vmatpush1.bf16.msra.mxu0 %v4417_v2  ;;  %v4548_v1 = vld [vmem:[%s6404_s1 + $0xf0] ss:$8 sps:$4 sm:$0xff]   ;;  %v4549_v2 = vld [vmem:[%s6405_s0] ss:$28 sps:$4 sm:$0xff]  }
  0x6c   :  { %1778 = vmatprep.subr.bf16.mxu0 %v4425_v3  ;;  %1401 = vmatpush1.bf16.msra.mxu1 %v4548_v1  ;;  %v4551_v3 = vld [vmem:[%s6405_s0 + $0x4] ss:$28 sps:$4 sm:$0xff]   ;;  %v4609_v62 = vld [vmem:[%s6405_s0 + $0x310] ss:$28 sps:$4 sm:$0xff]  }
  0x6d   :  { %1402 = vmatprep.mubr.bf16.mxu1 %v4551_v3  ;;  %3805 = vmatprep.subr.bf16.mxu1 %v4600_v53  ;;  %v4538_v1 = vld [vmem:[%s6405_s0 + $0x320] ss:$28 sps:$4 sm:$0xff]   ;;  %v4613_v3 = vld [vmem:[%s6405_s0 + $0x34c] ss:$28 sps:$4 sm:$0xff]  }
  0x6f   :  { %1779 = vmatpush1.bf16.msra.mxu0 %v4423_v4  ;;  %1403 = vmatmul.mubr.bf16.vlgmr.msra.gmra.mrb[0].mxu1 %v4549_v2  ;;  %v4450_v4 = vld [vmem:[%s6405_s0 + $0x10] ss:$28 sps:$4 sm:$0xff]   ;;  %v4543_v2 = vld [vmem:[%s6405_s0 + $0x35c] ss:$28 sps:$4 sm:$0xff]  }
  0x70   :  { %1780 = vmatprep.subr.bf16.mxu0 %v4431_v5  ;;  %v4453_v5 = vld [vmem:[%s6404_s1 + $0x300] ss:$8 sps:$4 sm:$0xff]   ;;  %3806 = vmatpush3.bf16.msra.mxu1 %v4601_v55 }
  0x72   :  { %1656 = vmatmul.mubr.bf16.gmra.mrb[24].mxu0 %v4392_v6  ;;  %v4456_v6 = vld [vmem:[%s6405_s0 + $0x4c] ss:$28 sps:$4 sm:$0xff]  }
  0x73   :  { %1665 = vmatprep.mubr.bf16.mxu0 %v4396_v7  ;;  %1781 = vmatpush1.bf16.msra.mxu0 %v4429_v8  ;;  %v4553_v7 = vld [vmem:[%s6405_s0 + $0x3c] ss:$28 sps:$4 sm:$0xff]  }
  0x74   :  { %1782 = vmatprep.subr.bf16.mxu0 %v4437_v9  ;;  %v4555_v8 = vld [vmem:[%s6405_s0 + $0x38] ss:$28 sps:$4 sm:$0xff]   ;;  %1412 = vmatprep.mubr.bf16.mxu1 %v4553_v7  ;;  %v4458_v9 = vld [vmem:[%s6405_s0 + $0x48] ss:$28 sps:$4 sm:$0xff]  }
  0x75   :  { %v4618_v7 = vld [vmem:[%s6406_s3 + $0x10] sm:$0xff]  }
  0x77   :  { %1783 = vmatpush1.bf16.msra.mxu0 %v4435_v10  ;;  %1413 = vmatmul.mubr.bf16.gmra.mrb[4].mxu1 %v4555_v8  ;;  %v4459_v10 = vld [vmem:[%s6405_s0 + $0x84] ss:$28 sps:$4 sm:$0xff]   ;;  %v4619_v8 = vld [vmem:[%s6406_s3 + $0x58] sm:$0xff]  }
  0x78   :  { %1784 = vmatprep.subr.bf16.mxu0 %v4443_v11  ;;  %v4557_v11 = vld [vmem:[%s6405_s0 + $0x74] ss:$28 sps:$4 sm:$0xff]  }
  0x79   :  { %1422 = vmatprep.mubr.bf16.mxu1 %v4557_v11  ;;  %v4552_v11 = vld [vmem:[%s6405_s0 + $0x18] ss:$28 sps:$4 sm:$0xff]  }
  0x7a   :  { %1666 = vmatmul.mubr.bf16.gmra.mrb[28].mxu0 %v4398_v12  ;;  %v4559_v12 = vld [vmem:[%s6405_s0 + $0x70] ss:$28 sps:$4 sm:$0xff]  }
  0x7b   :  { %1675 = vmatprep.mubr.bf16.mxu0 %v4402_v13  ;;  %1785 = vmatpush1.bf16.msra.mxu0 %v4441_v14  ;;  %v4461_v13 = vld [vmem:[%s6405_s0 + $0x80] ss:$28 sps:$4 sm:$0xff]  }
  0x7c   :  { %1786 = vmatprep.subr.bf16.mxu0 %v4449_v15  ;;  %v4462_v14 = vld [vmem:[%s6405_s0 + $0xbc] ss:$28 sps:$4 sm:$0xff]   ;;  %v4561_v15 = vld [vmem:[%s6405_s0 + $0xac] ss:$28 sps:$4 sm:$0xff]  }
  0x7f   :  { %1787 = vmatpush1.bf16.msra.mxu0 %v4447_v18  ;;  %1423 = vmatmul.mubr.bf16.gmra.mrb[8].mxu1 %v4559_v12  ;;  %v4465_v18 = vld [vmem:[%s6405_s0 + $0xf4] ss:$28 sps:$4 sm:$0xff]   ;;  %v4621_v12 = vld [vmem:[%s6406_s3 + $0x60] sm:$0xff]  }
  0x80   :  { %1949 = vmatprep.subr.bf16.mxu0 %v4455_v20  ;;  %1432 = vmatprep.mubr.bf16.mxu1 %v4561_v15  ;;  %v4567_v20 = vld [vmem:[%s6405_s0 + $0xe0] ss:$28 sps:$4 sm:$0xff]   ;;  %v4624_v15 = vld [vmem:[%s6406_s3 + $0x28] sm:$0xff]  }
  0x82   :  { %1676 = vmatmul.mubr.bf16.gmra.mrb[32].mxu0 %v4404_v21  ;;  %v4467_v21 = vld [vmem:[%s6405_s0 + $0xf0] ss:$28 sps:$4 sm:$0xff]  }
  0x83   :  { %1685 = vmatprep.mubr.bf16.mxu0 %v4408_v22  ;;  %v4468_v22 = vld [vmem:[%s6405_s0 + $0x12c] ss:$28 sps:$4 sm:$0xff]  }
  0x87   :  { %1433 = vmatmul.mubr.bf16.gmra.mrb[12].mxu1 %v4563_v16  ;;  %v4556_v16 = vld [vmem:[%s6405_s0 + $0x50] ss:$28 sps:$4 sm:$0xff]  }
  0x88   :  { %1442 = vmatprep.mubr.bf16.mxu1 %v4565_v19  ;;  %v4627_v19 = vld [vmem:[%s6406_s3 + $0x78] sm:$0xff]  }
  0x8a   :  { %1686 = vmatmul.mubr.bf16.gmra.mrb[36].mxu0 %v4410_v27  ;;  %v4573_v27 = vld [vmem:[%s6405_s0 + $0x154] ss:$28 sps:$4 sm:$0xff]  }
  0x8b   :  { %1695 = vmatprep.mubr.bf16.mxu0 %v4414_v28  ;;  %v4575_v28 = vld [vmem:[%s6405_s0 + $0x150] ss:$28 sps:$4 sm:$0xff]  }
  0x8f   :  { %1443 = vmatmul.mubr.bf16.gmra.mrb[16].mxu1 %v4567_v20  ;;  %v4628_v20 = vld [vmem:[%s6406_s3 + $0x38] sm:$0xff]  }
  0x90   :  { %1452 = vmatprep.mubr.bf16.mxu1 %v4569_v23  ;;  %v4568_v23 = vld [vmem:[%s6405_s0 + $0xf8] ss:$28 sps:$4 sm:$0xff]  }
  0x92   :  { %1696 = vmatmul.mubr.bf16.gmra.mrb[40].mxu0 %v4416_v33  ;;  %v4476_v33 = vld [vmem:[%s6405_s0 + $0x198] ss:$28 sps:$4 sm:$0xff]  }
  0x93   :  { %1705 = vmatprep.mubr.bf16.mxu0 %v4420_v34  ;;  %v4480_v34 = vld [vmem:[%s6405_s0 + $0x1d4] ss:$28 sps:$4 sm:$0xff]  }
  0x97   :  { %1453 = vmatmul.mubr.bf16.gmra.mrb[20].mxu1 %v4571_v24  ;;  %v4572_v24 = vld [vmem:[%s6405_s0 + $0x130] ss:$28 sps:$4 sm:$0xff]  }
  0x98   :  { %1462 = vmatprep.mubr.bf16.mxu1 %v4573_v27  ;;  %v4584_v27 = vld [vmem:[%s6405_s0 + $0x1d8] ss:$28 sps:$4 sm:$0xff]  }
  0x9a   :  { %1706 = vmatmul.mubr.bf16.gmra.mrb[44].mxu0 %v4422_v39  ;;  %v4585_v39 = vld [vmem:[%s6405_s0 + $0x1fc] ss:$28 sps:$4 sm:$0xff]  }
  0x9b   :  { %1715 = vmatprep.mubr.bf16.mxu0 %v4426_v40  ;;  %v4587_v40 = vld [vmem:[%s6405_s0 + $0x1f8] ss:$28 sps:$4 sm:$0xff]  }
  0x9f   :  { %1463 = vmatmul.mubr.bf16.gmra.mrb[24].mxu1 %v4575_v28  ;;  %v4588_v28 = vld [vmem:[%s6405_s0 + $0x210] ss:$28 sps:$4 sm:$0xff]  }
  0xa0   :  { %1472 = vmatprep.mubr.bf16.mxu1 %v4577_v31 }
  0xa2   :  { %1716 = vmatmul.mubr.bf16.gmra.mrb[48].mxu0 %v4428_v45  ;;  %v4502_v45 = vld [vmem:[%s6405_s0 + $0x240] ss:$28 sps:$4 sm:$0xff]  }
  0xa3   :  { %1725 = vmatprep.mubr.bf16.mxu0 %v4432_v46  ;;  %v4507_v46 = vld [vmem:[%s6405_s0 + $0x27c] ss:$28 sps:$4 sm:$0xff]  }
  0xa7   :  { %1473 = vmatmul.mubr.bf16.gmra.mrb[28].mxu1 %v4579_v32 }
  0xa8   :  { %1482 = vmatprep.mubr.bf16.mxu1 %v4581_v35 }
  0xaa   :  { %1726 = vmatmul.mubr.bf16.gmra.mrb[52].mxu0 %v4434_v51  ;;  %v4597_v51 = vld [vmem:[%s6405_s0 + $0x2a4] ss:$28 sps:$4 sm:$0xff]  }
  0xab   :  { %1735 = vmatprep.mubr.bf16.mxu0 %v4438_v52  ;;  %v4599_v52 = vld [vmem:[%s6405_s0 + $0x2a0] ss:$28 sps:$4 sm:$0xff]  }
  0xaf   :  { %1483 = vmatmul.mubr.bf16.gmra.mrb[32].mxu1 %v4583_v36 }
  0xb0   :  { %1492 = vmatprep.mubr.bf16.mxu1 %v4585_v39  ;;  %v4602_v39 = vld [vmem:[%s6405_s0 + $0x2b8] ss:$28 sps:$4 sm:$0xff]  }
  0xb2   :  { %1736 = vmatmul.mubr.bf16.gmra.mrb[56].mxu0 %v4440_v57  ;;  %v4603_v57 = vld [vmem:[%s6405_s0 + $0x2dc] ss:$28 sps:$4 sm:$0xff]  }
  0xb3   :  { %1745 = vmatprep.mubr.bf16.mxu0 %v4444_v58  ;;  %v4605_v58 = vld [vmem:[%s6405_s0 + $0x2d8] ss:$28 sps:$4 sm:$0xff]  }
  0xb7   :  { %1493 = vmatmul.mubr.bf16.gmra.mrb[36].mxu1 %v4587_v40 }
  0xb8   :  { %1502 = vmatprep.mubr.bf16.mxu1 %v4589_v43 }
  0xba   :  { %1746 = vmatmul.mubr.bf16.gmra.mrb[60].mxu0 %v4446_v63  ;;  %v4610_v63 = vld [vmem:[%s6406_s3 + $0x48] sm:$0xff]  }
  0xbb   :  { %1788 = vmatprep.mubr.bf16.mxu0 %v4452_v0  ;;  %v4611_v0 = vld [vmem:[%s6406_s3 + $0x8] sm:$0xff]   ;;  %3807 = vmatprep.subr.bf16.mxu1 %v4610_v63 }
  0xbc   :  { %3808 = vmatpush3.bf16.msra.mxu1 %v4611_v0 }
  0xbf   :  { %1503 = vmatmul.mubr.bf16.gmra.mrb[40].mxu1 %v4591_v44  ;;  %v4606_v44 = vld [vmem:[%s6405_s0 + $0x2f0] ss:$28 sps:$4 sm:$0xff]  }
  0xc0   :  { %1512 = vmatprep.mubr.bf16.mxu1 %v4593_v47 }
  0xc2   :  { %1789 = vmatmul.mubr.bf16.vlgmr.msra.gmra.mrb[0].mxu0 %v4450_v4  ;;  %v4615_v4 = vld [vmem:[%s6405_s0 + $0x348] ss:$28 sps:$4 sm:$0xff]  }
  0xc3   :  { %1950 = vmatpush1.bf16.msra.mxu0 %v4453_v5  ;;  %1798 = vmatprep.mubr.bf16.mxu0 %v4456_v6  ;;  %v4547_v5 = vld [vmem:[%s6405_s0 + $0x358] ss:$28 sps:$4 sm:$0xff]  }
  0xc4   :  { %v4617_v6 = vld [vmem:[%s6406_s3 + $0x50] sm:$0xff]  }
  0xc5   :  { %3809 = vmatprep.subr.bf16.mxu1 %v4617_v6 }
  0xc6   :  { %3810 = vmatpush3.bf16.msra.mxu1 %v4618_v7 }
  0xc7   :  { %1513 = vmatmul.mubr.bf16.gmra.mrb[44].mxu1 %v4595_v48  ;;  %3811 = vmatprep.subr.bf16.mxu1 %v4619_v8 }
  0xc8   :  { %1522 = vmatprep.mubr.bf16.mxu1 %v4597_v51 }
  0xca   :  { %1799 = vmatmul.mubr.bf16.gmra.mrb[4].mxu0 %v4458_v9  ;;  %v4769_v9 = vmov 0  }
  0xcb   :  { %1808 = vmatprep.mubr.bf16.mxu0 %v4459_v10  ;;  %v4620_v10 = vld [vmem:[%s6406_s3 + $0x18] sm:$0xff]  }
  0xcc   :  { %3812 = vmatpush3.bf16.msra.mxu1 %v4620_v10 }
  0xcd   :  { %3813 = vmatprep.subr.bf16.mxu1 %v4621_v12 }
  0xcf   :  { %1523 = vmatmul.mubr.bf16.gmra.mrb[48].mxu1 %v4599_v52 }
  0xd0   :  { %1532 = vmatprep.mubr.bf16.mxu1 %v4603_v57 }
  0xd2   :  { %1809 = vmatmul.mubr.bf16.gmra.mrb[8].mxu0 %v4461_v13  ;;  %v4622_v13 = vld [vmem:[%s6406_s3 + $0x20] sm:$0xff]  }
  0xd3   :  { %1818 = vmatprep.mubr.bf16.mxu0 %v4462_v14  ;;  %v4623_v14 = vld [vmem:[%s6406_s3 + $0x68] sm:$0xff]   ;;  %3814 = vmatpush3.bf16.msra.mxu1 %v4622_v13 }
  0xd4   :  { %3815 = vmatprep.subr.bf16.mxu1 %v4623_v14 }
  0xd7   :  { %1533 = vmatmul.mubr.bf16.gmra.mrb[52].mxu1 %v4605_v58 }
  0xd8   :  { %1542 = vmatprep.mubr.bf16.mxu1 %v4607_v61  ;;  %3816 = vmatpush3.bf16.msra.mxu1 %v4624_v15 }
  0xda   :  { %1819 = vmatmul.mubr.bf16.gmra.mrb[12].mxu0 %v4464_v17  ;;  %v4625_v17 = vld [vmem:[%s6406_s3 + $0x70] sm:$0xff]  }
  0xdb   :  { %1828 = vmatprep.mubr.bf16.mxu0 %v4465_v18  ;;  %v4626_v18 = vld [vmem:[%s6406_s3 + $0x30] sm:$0xff]   ;;  %3817 = vmatprep.subr.bf16.mxu1 %v4625_v17 }
  0xdc   :  { %3818 = vmatpush3.bf16.msra.mxu1 %v4626_v18 }
  0xdd   :  { %3819 = vmatprep.subr.bf16.mxu1 %v4627_v19 }
  0xdf   :  { %1543 = vmatmul.mubr.bf16.gmra.mrb[56].mxu1 %v4609_v62 }
  0xe0   :  { %1552 = vmatprep.mubr.bf16.mxu1 %v4613_v3  ;;  %3820 = vmatpush3.bf16.msra.mxu1 %v4628_v20 }
  0xe2   :  { %1829 = vmatmul.mubr.bf16.gmra.mrb[16].mxu0 %v4467_v21  ;;  %v4560_v21 = vld [vmem:[%s6405_s0 + $0x88] ss:$28 sps:$4 sm:$0xff]  }
  0xe3   :  { %1838 = vmatprep.mubr.bf16.mxu0 %v4468_v22  ;;  %v4564_v22 = vld [vmem:[%s6405_s0 + $0xc0] ss:$28 sps:$4 sm:$0xff]  }
  0xe7   :  { %1553 = vmatmul.mubr.bf16.gmra.mrb[60].mxu1 %v4615_v4 }
  0xea   :  { %1839 = vmatmul.mubr.bf16.gmra.mrb[20].mxu0 %v4470_v25  ;;  %v4576_v25 = vld [vmem:[%s6405_s0 + $0x168] ss:$28 sps:$4 sm:$0xff]  }
  0xeb   :  { %1848 = vmatprep.mubr.bf16.mxu0 %v4471_v26  ;;  %v4580_v26 = vld [vmem:[%s6405_s0 + $0x1a0] ss:$28 sps:$4 sm:$0xff]  }
  0xf2   :  { %1849 = vmatmul.mubr.bf16.gmra.mrb[24].mxu0 %v4473_v29  ;;  %v4592_v29 = vld [vmem:[%s6405_s0 + $0x248] ss:$28 sps:$4 sm:$0xff]  }
  0xf3   :  { %1858 = vmatprep.mubr.bf16.mxu0 %v4474_v30 }
  0xfa   :  { %1859 = vmatmul.mubr.bf16.gmra.mrb[28].mxu0 %v4476_v33 }
  0xfb   :  { %1868 = vmatprep.mubr.bf16.mxu0 %v4480_v34  ;;  %v4596_v34 = vld [vmem:[%s6405_s0 + $0x280] ss:$28 sps:$4 sm:$0xff]  }
 0x102   :  { %1869 = vmatmul.mubr.bf16.gmra.mrb[32].mxu0 %v4484_v37 }
 0x103   :  { %1878 = vmatprep.mubr.bf16.mxu0 %v4489_v38 }
 0x10a   :  { %1879 = vmatmul.mubr.bf16.gmra.mrb[36].mxu0 %v4493_v41 }
 0x10b   :  { %1888 = vmatprep.mubr.bf16.mxu0 %v4498_v42 }
 0x112   :  { %1889 = vmatmul.mubr.bf16.gmra.mrb[40].mxu0 %v4502_v45 }
 0x113   :  { %1898 = vmatprep.mubr.bf16.mxu0 %v4507_v46 }
 0x11a   :  { %1899 = vmatmul.mubr.bf16.gmra.mrb[44].mxu0 %v4511_v49  ;;  %v4612_v49 = vld [vmem:[%s6405_s0 + $0x328] ss:$28 sps:$4 sm:$0xff]  }
 0x11b   :  { %1908 = vmatprep.mubr.bf16.mxu0 %v4516_v50 }
 0x122   :  { %1909 = vmatmul.mubr.bf16.gmra.mrb[48].mxu0 %v4520_v54  ;;  %v4616_v54 = vld [vmem:[%s6405_s0 + $0x360] ss:$28 sps:$4 sm:$0xff]  }
 0x123   :  { %1918 = vmatprep.mubr.bf16.mxu0 %v4525_v56 }
 0x12a   :  { %1919 = vmatmul.mubr.bf16.gmra.mrb[52].mxu0 %v4529_v59 }
 0x12b   :  { %1928 = vmatprep.mubr.bf16.mxu0 %v4534_v60 }
 0x132   :  { %1929 = vmatmul.mubr.bf16.gmra.mrb[56].mxu0 %v4538_v1 }
 0x133   :  { %1938 = vmatprep.mubr.bf16.mxu0 %v4543_v2 }
 0x13a   :  { %1939 = vmatmul.mubr.bf16.gmra.mrb[60].mxu0 %v4547_v5 }
 0x13b   :  { %1981 = vmatprep.mubr.bf16.mxu0 %v4769_v9 }
 0x142   :  { %3742 = vmatmul.mubr.msk.bf16.vlgmr.msra.gmra.mrb[0].mxu0 %vm1321_vm0, %v4552_v11  ;;  %v5504_v30 = vpop.f32.mrb[0].mxu1 }
 0x143   :  { %1991 = vmatprep.mubr.bf16.mxu0 %v4769_v9  ;;  %v5506_v31 = vpop.f32.mrb[1].mxu1 }
 0x144   :  { %v5509_v32 = vpop.f32.mrb[2].mxu1 }
 0x145   :  { %v5512_v33 = vpop.f32.mrb[3].mxu1 }
 0x14a   :  { %3743 = vmatmul.mubr.msk.bf16.gmra.mrb[4].mxu0 %vm1321_vm0, %v4556_v16  ;;  %v5517_v35 = vpop.f32.mrb[4].mxu1 }
 0x14b   :  { %2001 = vmatprep.mubr.bf16.mxu0 %v4769_v9  ;;  %v5519_v36 = vpop.f32.mrb[5].mxu1 }
 0x14c   :  { %v5522_v37 = vpop.f32.mrb[6].mxu1 }
 0x14d   :  { %v5525_v38 = vpop.f32.mrb[7].mxu1 }
 0x152   :  { %3744 = vmatmul.mubr.msk.bf16.gmra.mrb[8].mxu0 %vm1321_vm0, %v4560_v21  ;;  %v5530_v40 = vpop.f32.mrb[8].mxu1 }
 0x153   :  { %2011 = vmatprep.mubr.bf16.mxu0 %v4769_v9  ;;  %v5532_v41 = vpop.f32.mrb[9].mxu1 }
 0x154   :  { %v5535_v42 = vpop.f32.mrb[10].mxu1 }
 0x155   :  { %v5538_v43 = vpop.f32.mrb[11].mxu1 }
 0x15a   :  { %3745 = vmatmul.mubr.msk.bf16.gmra.mrb[12].mxu0 %vm1321_vm0, %v4564_v22  ;;  %v5543_v45 = vpop.f32.mrb[12].mxu1 }
 0x15b   :  { %2021 = vmatprep.mubr.bf16.mxu0 %v4769_v9  ;;  %v5545_v46 = vpop.f32.mrb[13].mxu1 }
 0x15c   :  { %v5548_v47 = vpop.f32.mrb[14].mxu1 }
 0x15d   :  { %v5551_v48 = vpop.f32.mrb[15].mxu1 }
 0x162   :  { %3746 = vmatmul.mubr.msk.bf16.gmra.mrb[16].mxu0 %vm1321_vm0, %v4568_v23  ;;  %v5556_v50 = vpop.f32.mrb[16].mxu1 }
 0x163   :  { %2031 = vmatprep.mubr.bf16.mxu0 %v4769_v9  ;;  %v5558_v51 = vpop.f32.mrb[17].mxu1 }
 0x164   :  { %v5561_v52 = vpop.f32.mrb[18].mxu1 }
 0x165   :  { %v5564_v53 = vpop.f32.mrb[19].mxu1 }
 0x16a   :  { %3747 = vmatmul.mubr.msk.bf16.gmra.mrb[20].mxu0 %vm1321_vm0, %v4572_v24  ;;  %v5569_v55 = vpop.f32.mrb[20].mxu1 }
 0x16b   :  { %2041 = vmatprep.mubr.bf16.mxu0 %v4769_v9  ;;  %v5571_v56 = vpop.f32.mrb[21].mxu1 }
 0x16c   :  { %v5574_v57 = vpop.f32.mrb[22].mxu1 }
 0x16d   :  { %v5576_v58 = vpop.f32.mrb[23].mxu1 }
 0x172   :  { %3748 = vmatmul.mubr.msk.bf16.gmra.mrb[24].mxu0 %vm1321_vm0, %v4576_v25  ;;  %v5578_v59 = vpop.f32.mrb[24].mxu1 }
 0x173   :  { %2051 = vmatprep.mubr.bf16.mxu0 %v4769_v9  ;;  %v5580_v60 = vpop.f32.mrb[25].mxu1 }
 0x174   :  { %v5582_v61 = vpop.f32.mrb[26].mxu1 }
 0x175   :  { %v5584_v62 = vpop.f32.mrb[27].mxu1 }
 0x17a   :  { %3749 = vmatmul.mubr.msk.bf16.gmra.mrb[28].mxu0 %vm1321_vm0, %v4580_v26  ;;  %v5586_v63 = vpop.f32.mrb[28].mxu1 }
 0x17b   :  { %2061 = vmatprep.mubr.bf16.mxu0 %v4769_v9  ;;  %v5588_v0 = vpop.f32.mrb[29].mxu1 }
 0x17c   :  { %v5590_v1 = vpop.f32.mrb[30].mxu1 }
 0x17d   :  { %v5592_v2 = vpop.f32.mrb[31].mxu1 }
 0x182   :  { %3750 = vmatmul.mubr.msk.bf16.gmra.mrb[32].mxu0 %vm1321_vm0, %v4584_v27  ;;  %v5594_v3 = vpop.f32.mrb[32].mxu1 }
 0x183   :  { %2071 = vmatprep.mubr.bf16.mxu0 %v4769_v9  ;;  %v5596_v4 = vpop.f32.mrb[33].mxu1 }
 0x184   :  { %v5598_v5 = vpop.f32.mrb[34].mxu1 }
 0x185   :  { %v5600_v6 = vpop.f32.mrb[35].mxu1 }
 0x18a   :  { %3751 = vmatmul.mubr.msk.bf16.gmra.mrb[36].mxu0 %vm1321_vm0, %v4588_v28  ;;  %v5602_v7 = vpop.f32.mrb[36].mxu1 }
 0x18b   :  { %2081 = vmatprep.mubr.bf16.mxu0 %v4769_v9  ;;  %v5604_v8 = vpop.f32.mrb[37].mxu1 }
 0x192   :  { %3752 = vmatmul.mubr.msk.bf16.gmra.mrb[40].mxu0 %vm1321_vm0, %v4592_v29  ;;  %v261_v29 = vlaneseq }
 0x193   :  { %2091 = vmatprep.mubr.bf16.mxu0 %v4769_v9 }
 0x19a   :  { %3753 = vmatmul.mubr.msk.bf16.gmra.mrb[44].mxu0 %vm1321_vm0, %v4596_v34 }
 0x19b   :  { %2101 = vmatprep.mubr.bf16.mxu0 %v4769_v9 }
 0x1a2   :  { %3754 = vmatmul.mubr.msk.bf16.gmra.mrb[48].mxu0 %vm1321_vm0, %v4602_v39 }
 0x1a3   :  { %2111 = vmatprep.mubr.bf16.mxu0 %v4769_v9 }
 0x1aa   :  { %3755 = vmatmul.mubr.msk.bf16.gmra.mrb[52].mxu0 %vm1321_vm0, %v4606_v44  ;;  %v262_v44 = vshrl.u32 %v261_v29, 7 }
 0x1ab   :  { %2121 = vmatprep.mubr.bf16.mxu0 %v4769_v9 }
 0x1b2   :  { %3756 = vmatmul.mubr.msk.bf16.gmra.mrb[56].mxu0 %vm1321_vm0, %v4612_v49 }
 0x1b3   :  { %2131 = vmatprep.mubr.bf16.mxu0 %v4769_v9  ;;  %v5606_v9 = vpop.f32.mrb[38].mxu1 }
 0x1b4   :  { %v5608_v10 = vpop.f32.mrb[39].mxu1 }
 0x1b5   :  { %v5610_v11 = vpop.f32.mrb[40].mxu1 }
 0x1b6   :  { %v5612_v12 = vpop.f32.mrb[41].mxu1 }
 0x1b7   :  { %v5614_v13 = vpop.f32.mrb[42].mxu1 }
 0x1b8   :  { %v5616_v14 = vpop.f32.mrb[43].mxu1 }
 0x1b9   :  { %v5618_v15 = vpop.f32.mrb[44].mxu1 }
 0x1ba   :  { %3757 = vmatmul.mubr.msk.bf16.gmra.mrb[60].mxu0 %vm1321_vm0, %v4616_v54  ;;  %v5620_v16 = vpop.f32.mrb[45].mxu1 }
 0x1bb   :  { %v5622_v17 = vpop.f32.mrb[46].mxu1 }
 0x1bc   :  { %v5624_v18 = vpop.f32.mrb[47].mxu1 }
 0x1bd   :  { %v5626_v19 = vpop.f32.mrb[48].mxu1 }
 0x1be   :  { %6414 = vst [vmem:[#allocation2_spill] sm:$0xff] %v5626_v19  ;;  %v5628_v20 = vpop.f32.mrb[49].mxu1 }
 0x1bf   :  { %6415 = vst [vmem:[#allocation3_spill] sm:$0xff] %v5628_v20  ;;  %v5630_v21 = vpop.f32.mrb[50].mxu1 }
 0x1c0   :  { %6416 = vst [vmem:[#allocation4_spill] sm:$0xff] %v5630_v21  ;;  %v5632_v22 = vpop.f32.mrb[51].mxu1 }
 0x1c1   :  { %6417 = vst [vmem:[#allocation5_spill] sm:$0xff] %v5632_v22  ;;  %v5634_v23 = vpop.f32.mrb[52].mxu1 }
 0x1c2   :  { %6418 = vst [vmem:[#allocation6_spill] sm:$0xff] %v5634_v23  ;;  %v5636_v24 = vpop.f32.mrb[53].mxu1  ;;  %v263_v23 = vsub.s32 0, %v262_v44 }
 0x1c3   :  { %6419 = vst [vmem:[#allocation7_spill] sm:$0xff] %v5636_v24  ;;  %v5638_v25 = vpop.f32.mrb[54].mxu1 }
 0x1c4   :  { %6420 = vst [vmem:[#allocation8_spill] sm:$0xff] %v5638_v25  ;;  %v5640_v26 = vpop.f32.mrb[55].mxu1 }
 0x1c5   :  { %6421 = vst [vmem:[#allocation9_spill] sm:$0xff] %v5640_v26  ;;  %v5642_v27 = vpop.f32.mrb[56].mxu1  ;;  %v259_v26 = vld [vmem:[%s6407_s2] sm:$0x3] }
 0x1c6   :  { %6422 = vst [vmem:[#allocation10_spill] sm:$0xff] %v5642_v27  ;;  %v5644_v28 = vpop.f32.mrb[57].mxu1  ;;  %v267_v27 = vsub.s32 1, %v262_v44 }
 0x1c7   :  { %6423 = vst [vmem:[#allocation11_spill] sm:$0xff] %v5644_v28  ;;  %v5646_v34 = vpop.f32.mrb[58].mxu1  ;;  %v5661_v28 = vrot.slane %v259_v26, %v263_v23 }
 0x1c8   :  { %6424 = vst [vmem:[#allocation12_spill] sm:$0xff] %v5646_v34  ;;  %v5648_v39 = vpop.f32.mrb[59].mxu1  ;;  %v5663_v34 = vrot.slane %v259_v26, %v267_v27 }
 0x1c9   :  { %6425 = vst [vmem:[#allocation13_spill] sm:$0xff] %v5648_v39  ;;  %v5650_v49 = vpop.f32.mrb[60].mxu1  ;;  %v1405_v29 = vadd.f32 %v5504_v30, %v5661_v28  ;;  %v4629_v30 = vld [vmem:[%s6408_s5] sm:$0xff]   ;;  %v1415_v19 = vadd.f32 %v5517_v35, %v5661_v28 }
 0x1ca   :  { %6426 = vst [vmem:[#allocation14_spill] sm:$0xff] %v5650_v49  ;;  %v5652_v54 = vpop.f32.mrb[61].mxu1  ;;  %v1411_v44 = vadd.f32 %v5512_v33, %v5663_v34  ;;  %3961 = vmatprep.subr.bf16.mxu1 %v4629_v30  ;;  %v1421_v35 = vadd.f32 %v5525_v38, %v5663_v34 }
 0x1cb   :  { %6427 = vst [vmem:[#allocation15_spill] sm:$0xff] %v5652_v54  ;;  %v5654_v24 = vpop.f32.mrb[62].mxu1  ;;  %v1407_v54 = vadd.f32 %v5506_v31, %v5663_v34 }
 0x1cc   :  { %6428 = vst [vmem:[#allocation16_spill] sm:$0xff] %v5654_v24  ;;  %v5659_v25 = vpop.f32.mrb[63].mxu1  ;;  %v1409_v24 = vadd.f32 %v5509_v32, %v5661_v28 }
 0x1cd   :  { %6429 = vst [vmem:[#allocation17_spill] sm:$0xff] %v5659_v25 }
 0x215   :  { %v1983_v49 = vpop.f32.mrb[0].mxu0 }
 0x216   :  { %v4050_v39 = vadd.f32 %v1983_v49, %v1405_v29  ;;  %v1985_v22 = vpop.f32.mrb[1].mxu0  ;;  %v1417_v29 = vadd.f32 %v5519_v36, %v5663_v34 }
 0x217   :  { %v4052_v25 = vadd.f32 %v1985_v22, %v1407_v54  ;;  %v1987_v23 = vpop.f32.mrb[2].mxu0  ;;  %v1419_v54 = vadd.f32 %v5522_v37, %v5661_v28  ;;  %v1425_v37 = vadd.f32 %v5530_v40, %v5661_v28  ;;  %v4632_v40 = vld [vmem:[%s6408_s5 + $0x18] sm:$0xff]  }
 0x218   :  { %v4054_v21 = vadd.f32 %v1987_v23, %v1409_v24  ;;  %v1989_v26 = vpop.f32.mrb[3].mxu0  ;;  %v2142_v20 = vmax.f32 %v4050_v39, 0.0 }
 0x219   :  { %v4056_v27 = vadd.f32 %v1989_v26, %v1411_v44  ;;  %v2143_v32 = vmax.f32 %v4052_v25, 0.0 }
 0x21a   :  { %v2144_v31 = vmax.f32 %v4054_v21, 0.0  ;;  %v4630_v21 = vld [vmem:[%s6408_s5 + $0x8] sm:$0xff]  }
 0x21b   :  { %v2145_v49 = vmax.f32 %v4056_v27, 0.0 }
 0x21c   :  { %v2206_v33 = vpack.c.bf16 %v2144_v31, %v2142_v20 }
 0x21d   :  { %v2207_v22 = vpack.c.bf16 %v2145_v49, %v2143_v32  ;;  %v1993_v24 = vpop.f32.mrb[4].mxu0  ;;  %v1427_v49 = vadd.f32 %v5532_v41, %v5663_v34 }
 0x21e   :  { %v4058_v44 = vadd.f32 %v1993_v24, %v1415_v19  ;;  %v1995_v23 = vpop.f32.mrb[5].mxu0  ;;  %v4631_v19 = vld [vmem:[%s6408_s5 + $0x10] sm:$0xff]  }
 0x21f   :  { %v4060_v25 = vadd.f32 %v1995_v23, %v1417_v29  ;;  %v1997_v39 = vpop.f32.mrb[6].mxu0  ;;  %2405 = vmatprep.mubr.bf16.mxu1 %v2207_v22 }
 0x220   :  { %v4062_v36 = vadd.f32 %v1997_v39, %v1419_v54  ;;  %v1999_v26 = vpop.f32.mrb[7].mxu0  ;;  %2406 = vmatmul.mubr.bf16.vlgmr.msra.gmra.mrb[64].mxu1 %v2206_v33  ;;  %v2146_v27 = vmax.f32 %v4058_v44, 0.0  ;;  %v1431_v44 = vadd.f32 %v5538_v43, %v5663_v34 }
 0x221   :  { %v4064_v20 = vadd.f32 %v1999_v26, %v1421_v35  ;;  %3962 = vmatpush3.bf16.msra.mxu1 %v4629_v30  ;;  %v2147_v32 = vmax.f32 %v4060_v25, 0.0  ;;  %v1429_v30 = vadd.f32 %v5535_v42, %v5661_v28 }
 0x222   :  { %v2148_v31 = vmax.f32 %v4062_v36, 0.0  ;;  %3963 = vmatprep.subr.bf16.mxu1 %v4630_v21  ;;  %v1435_v36 = vadd.f32 %v5543_v45, %v5661_v28 }
 0x223   :  { %v2149_v38 = vmax.f32 %v4064_v20, 0.0 }
 0x224   :  { %v2208_v29 = vpack.c.bf16 %v2148_v31, %v2146_v27  ;;  %v1437_v27 = vadd.f32 %v5545_v46, %v5663_v34 }
 0x225   :  { %v2209_v22 = vpack.c.bf16 %v2149_v38, %v2147_v32  ;;  %v2003_v33 = vpop.f32.mrb[8].mxu0  ;;  %3964 = vmatpush3.bf16.msra.mxu1 %v4630_v21  ;;  %v1439_v32 = vadd.f32 %v5548_v47, %v5661_v28  ;;  %v1447_v47 = vadd.f32 %v5558_v51, %v5663_v34 }
 0x226   :  { %v4066_v24 = vadd.f32 %v2003_v33, %v1425_v37  ;;  %v2005_v54 = vpop.f32.mrb[9].mxu0  ;;  %3965 = vmatprep.subr.bf16.mxu1 %v4631_v19 }
 0x227   :  { %v4068_v23 = vadd.f32 %v2005_v54, %v1427_v49  ;;  %v2007_v35 = vpop.f32.mrb[10].mxu0  ;;  %2413 = vmatprep.mubr.bf16.mxu1 %v2209_v22  ;;  %v1441_v49 = vadd.f32 %v5551_v48, %v5663_v34  ;;  %v1445_v54 = vadd.f32 %v5556_v50, %v5661_v28 }
 0x228   :  { %v4070_v41 = vadd.f32 %v2007_v35, %v1429_v30  ;;  %v2009_v25 = vpop.f32.mrb[11].mxu0  ;;  %2414 = vmatmul.mubr.bf16.gmra.mrb[68].mxu1 %v2208_v29  ;;  %v2150_v39 = vmax.f32 %v4066_v24, 0.0 }
 0x229   :  { %v4072_v21 = vadd.f32 %v2009_v25, %v1431_v44  ;;  %3966 = vmatpush3.bf16.msra.mxu1 %v4631_v19  ;;  %v2151_v26 = vmax.f32 %v4068_v23, 0.0 }
 0x22a   :  { %v2152_v42 = vmax.f32 %v4070_v41, 0.0  ;;  %3967 = vmatprep.subr.bf16.mxu1 %v4632_v40  ;;  %v1449_v41 = vadd.f32 %v5561_v52, %v5661_v28  ;;  %v1457_v52 = vadd.f32 %v5571_v56, %v5663_v34 }
 0x22b   :  { %v2153_v20 = vmax.f32 %v4072_v21, 0.0 }
 0x22c   :  { %v2210_v43 = vpack.c.bf16 %v2152_v42, %v2150_v39  ;;  %v1451_v39 = vadd.f32 %v5564_v53, %v5663_v34 }
 0x22d   :  { %v2211_v31 = vpack.c.bf16 %v2153_v20, %v2151_v26  ;;  %v2013_v37 = vpop.f32.mrb[12].mxu0  ;;  %3968 = vmatpush3.bf16.msra.mxu1 %v4632_v40 }
 0x22e   :  { %v4074_v38 = vadd.f32 %v2013_v37, %v1435_v36  ;;  %v2015_v19 = vpop.f32.mrb[13].mxu0 }
 0x22f   :  { %v4076_v29 = vadd.f32 %v2015_v19, %v1437_v27  ;;  %v2017_v45 = vpop.f32.mrb[14].mxu0  ;;  %2421 = vmatprep.mubr.bf16.mxu1 %v2211_v31  ;;  %v1459_v19 = vadd.f32 %v5574_v57, %v5661_v28  ;;  %v1467_v57 = vadd.f32 %v5580_v60, %v5663_v34 }
 0x230   :  { %v4078_v22 = vadd.f32 %v2017_v45, %v1439_v32  ;;  %v2019_v33 = vpop.f32.mrb[15].mxu0  ;;  %2422 = vmatmul.mubr.bf16.gmra.mrb[72].mxu1 %v2210_v43  ;;  %v2154_v46 = vmax.f32 %v4074_v38, 0.0  ;;  %v1455_v43 = vadd.f32 %v5569_v55, %v5661_v28  ;;  %v1461_v45 = vadd.f32 %v5576_v58, %v5663_v34 }
 0x231   :  { %v4080_v30 = vadd.f32 %v2019_v33, %v1441_v49  ;;  %v2155_v40 = vmax.f32 %v4076_v29, 0.0 }
 0x232   :  { %v2156_v24 = vmax.f32 %v4078_v22, 0.0 }
 0x233   :  { %v2157_v44 = vmax.f32 %v4080_v30, 0.0 }
 0x234   :  { %v2212_v23 = vpack.c.bf16 %v2156_v24, %v2154_v46 }
 0x235   :  { %v2213_v35 = vpack.c.bf16 %v2157_v44, %v2155_v40  ;;  %v2023_v48 = vpop.f32.mrb[16].mxu0 }
 0x236   :  { %v4082_v25 = vadd.f32 %v2023_v48, %v1445_v54  ;;  %v2025_v21 = vpop.f32.mrb[17].mxu0  ;;  %v1465_v54 = vadd.f32 %v5578_v59, %v5661_v28 }
 0x237   :  { %v4084_v42 = vadd.f32 %v2025_v21, %v1447_v47  ;;  %v2027_v36 = vpop.f32.mrb[18].mxu0  ;;  %2429 = vmatprep.mubr.bf16.mxu1 %v2213_v35  ;;  %v1469_v35 = vadd.f32 %v5582_v61, %v5661_v28  ;;  %v1477_v61 = vadd.f32 %v5588_v0, %v5663_v34 }
 0x238   :  { %v4086_v50 = vadd.f32 %v2027_v36, %v1449_v41  ;;  %v2029_v26 = vpop.f32.mrb[19].mxu0  ;;  %2430 = vmatmul.mubr.bf16.gmra.mrb[76].mxu1 %v2212_v23  ;;  %v2158_v27 = vmax.f32 %v4082_v25, 0.0  ;;  %v1471_v25 = vadd.f32 %v5584_v62, %v5663_v34 }
 0x239   :  { %v4088_v20 = vadd.f32 %v2029_v26, %v1451_v39  ;;  %v2159_v31 = vmax.f32 %v4084_v42, 0.0  ;;  %v1475_v26 = vadd.f32 %v5586_v63, %v5661_v28 }
 0x23a   :  { %v2160_v51 = vmax.f32 %v4086_v50, 0.0 }
 0x23b   :  { %v2161_v37 = vmax.f32 %v4088_v20, 0.0 }
 0x23c   :  { %v2214_v32 = vpack.c.bf16 %v2160_v51, %v2158_v27 }
 0x23d   :  { %v2215_v38 = vpack.c.bf16 %v2161_v37, %v2159_v31  ;;  %v2033_v53 = vpop.f32.mrb[20].mxu0  ;;  %v1479_v31 = vadd.f32 %v5590_v1, %v5661_v28  ;;  %v1487_v1 = vadd.f32 %v5596_v4, %v5663_v34 }
 0x23e   :  { %v4090_v49 = vadd.f32 %v2033_v53, %v1455_v43  ;;  %v2035_v29 = vpop.f32.mrb[21].mxu0 }
 0x23f   :  { %v4092_v22 = vadd.f32 %v2035_v29, %v1457_v52  ;;  %v2037_v33 = vpop.f32.mrb[22].mxu0  ;;  %2437 = vmatprep.mubr.bf16.mxu1 %v2215_v38 }
 0x240   :  { %v4094_v55 = vadd.f32 %v2037_v33, %v1459_v19  ;;  %v2039_v30 = vpop.f32.mrb[23].mxu0  ;;  %2438 = vmatmul.mubr.bf16.gmra.mrb[80].mxu1 %v2214_v32  ;;  %v2162_v24 = vmax.f32 %v4090_v49, 0.0  ;;  %v1481_v32 = vadd.f32 %v5592_v2, %v5663_v34 }
 0x241   :  { %v4096_v46 = vadd.f32 %v2039_v30, %v1461_v45  ;;  %v2163_v40 = vmax.f32 %v4092_v22, 0.0  ;;  %v1485_v45 = vadd.f32 %v5594_v3, %v5661_v28 }
 0x242   :  { %v2164_v56 = vmax.f32 %v4094_v55, 0.0 }
 0x243   :  { %v2165_v44 = vmax.f32 %v4096_v46, 0.0  ;;  %v1489_v46 = vadd.f32 %v5598_v5, %v5661_v28  ;;  %v1497_v5 = vadd.f32 %v5604_v8, %v5663_v34 }
 0x244   :  { %v2216_v47 = vpack.c.bf16 %v2164_v56, %v2162_v24 }
 0x245   :  { %v2217_v23 = vpack.c.bf16 %v2165_v44, %v2163_v40  ;;  %v2043_v58 = vpop.f32.mrb[24].mxu0 }
 0x246   :  { %v4098_v48 = vadd.f32 %v2043_v58, %v1465_v54  ;;  %v2045_v41 = vpop.f32.mrb[25].mxu0  ;;  %v1491_v54 = vadd.f32 %v5600_v6, %v5663_v34  ;;  %v1495_v58 = vadd.f32 %v5602_v7, %v5661_v28 }
 0x247   :  { %v4100_v21 = vadd.f32 %v2045_v41, %v1467_v57  ;;  %v2047_v39 = vpop.f32.mrb[26].mxu0  ;;  %2445 = vmatprep.mubr.bf16.mxu1 %v2217_v23 }
 0x248   :  { %v4102_v59 = vadd.f32 %v2047_v39, %v1469_v35  ;;  %v2049_v42 = vpop.f32.mrb[27].mxu0  ;;  %2446 = vmatmul.mubr.bf16.gmra.mrb[84].mxu1 %v2216_v47  ;;  %v2166_v50 = vmax.f32 %v4098_v48, 0.0 }
 0x249   :  { %v4104_v36 = vadd.f32 %v2049_v42, %v1471_v25  ;;  %v2167_v20 = vmax.f32 %v4100_v21, 0.0  ;;  %v1499_v21 = vadd.f32 %v5606_v9, %v5661_v28  ;;  %v1501_v42 = vadd.f32 %v5608_v10, %v5663_v34 }
 0x24a   :  { %v2168_v60 = vmax.f32 %v4102_v59, 0.0  ;;  %v1507_v9 = vadd.f32 %v5612_v12, %v5663_v34 }
 0x24b   :  { %v2169_v27 = vmax.f32 %v4104_v36, 0.0 }
 0x24c   :  { %v2218_v51 = vpack.c.bf16 %v2168_v60, %v2166_v50 }
 0x24d   :  { %v2219_v43 = vpack.c.bf16 %v2169_v27, %v2167_v20  ;;  %v2053_v62 = vpop.f32.mrb[28].mxu0  ;;  %v1505_v27 = vadd.f32 %v5610_v11, %v5661_v28 }
 0x24e   :  { %v4106_v37 = vadd.f32 %v2053_v62, %v1475_v26  ;;  %v2055_v52 = vpop.f32.mrb[29].mxu0 }
 0x24f   :  { %v4108_v38 = vadd.f32 %v2055_v52, %v1477_v61  ;;  %v2057_v53 = vpop.f32.mrb[30].mxu0  ;;  %2453 = vmatprep.mubr.bf16.mxu1 %v2219_v43 }
 0x250   :  { %v4110_v63 = vadd.f32 %v2057_v53, %v1479_v31  ;;  %v2059_v19 = vpop.f32.mrb[31].mxu0  ;;  %2454 = vmatmul.mubr.bf16.gmra.mrb[88].mxu1 %v2218_v51  ;;  %v2170_v29 = vmax.f32 %v4106_v37, 0.0  ;;  %v1509_v31 = vadd.f32 %v5614_v13, %v5661_v28  ;;  %v1517_v13 = vadd.f32 %v5620_v16, %v5663_v34 }
 0x251   :  { %v4112_v49 = vadd.f32 %v2059_v19, %v1481_v32  ;;  %v2171_v22 = vmax.f32 %v4108_v38, 0.0  ;;  %v1511_v32 = vadd.f32 %v5616_v14, %v5663_v34 }
 0x252   :  { %v2172_v0 = vmax.f32 %v4110_v63, 0.0 }
 0x253   :  { %v2173_v33 = vmax.f32 %v4112_v49, 0.0 }
 0x254   :  { %v2220_v55 = vpack.c.bf16 %v2172_v0, %v2170_v29  ;;  %v1515_v29 = vadd.f32 %v5618_v15, %v5661_v28 }
 0x255   :  { %v2221_v30 = vpack.c.bf16 %v2173_v33, %v2171_v22  ;;  %v2063_v2 = vpop.f32.mrb[32].mxu0 }
 0x256   :  { %v4114_v24 = vadd.f32 %v2063_v2, %v1485_v45  ;;  %v2065_v56 = vpop.f32.mrb[33].mxu0  ;;  %v1521_v2 = vadd.f32 %v5624_v18, %v5663_v34 }
 0x257   :  { %v4116_v40 = vadd.f32 %v2065_v56, %v1487_v1  ;;  %v2067_v44 = vpop.f32.mrb[34].mxu0  ;;  %2461 = vmatprep.mubr.bf16.mxu1 %v2221_v30  ;;  %v1519_v1 = vadd.f32 %v5622_v17, %v5661_v28  ;;  %v6431_v17 = vld [vmem:[#allocation3_spill] sm:$0xff] }
 0x258   :  { %v4118_v3 = vadd.f32 %v2067_v44, %v1489_v46  ;;  %v2069_v57 = vpop.f32.mrb[35].mxu0  ;;  %2462 = vmatmul.mubr.bf16.gmra.mrb[92].mxu1 %v2220_v55  ;;  %v2174_v23 = vmax.f32 %v4114_v24, 0.0  ;;  %v6430_v44 = vld [vmem:[#allocation2_spill] sm:$0xff] }
 0x259   :  { %v4120_v47 = vadd.f32 %v2069_v57, %v1491_v54  ;;  %v2175_v35 = vmax.f32 %v4116_v40, 0.0 }
 0x25a   :  { %v2176_v4 = vmax.f32 %v4118_v3, 0.0  ;;  %v1525_v3 = vadd.f32 %v6430_v44, %v5661_v28 }
 0x25b   :  { %v2177_v48 = vmax.f32 %v4120_v47, 0.0 }
 0x25c   :  { %v2222_v41 = vpack.c.bf16 %v2176_v4, %v2174_v23  ;;  %v1527_v23 = vadd.f32 %v6431_v17, %v5663_v34 }
 0x25d   :  { %v2223_v25 = vpack.c.bf16 %v2177_v48, %v2175_v35  ;;  %v2073_v6 = vpop.f32.mrb[36].mxu0  ;;  %v4633_v35 = vld [vmem:[%s6408_s5 + $0x20] sm:$0xff]   ;;  %v6432_v48 = vld [vmem:[#allocation4_spill] sm:$0xff] }
 0x25e   :  { %v4122_v39 = vadd.f32 %v2073_v6, %v1495_v58  ;;  %v2075_v59 = vpop.f32.mrb[37].mxu0  ;;  %v6433_v6 = vld [vmem:[#allocation5_spill] sm:$0xff]  ;;  %3969 = vmatprep.subr.bf16.mxu1 %v4633_v35 }
 0x25f   :  { %v4124_v36 = vadd.f32 %v2075_v59, %v1497_v5  ;;  %v2077_v50 = vpop.f32.mrb[38].mxu0  ;;  %2469 = vmatprep.mubr.bf16.mxu1 %v2223_v25  ;;  %v1529_v5 = vadd.f32 %v6432_v48, %v5661_v28  ;;  %3970 = vmatpush3.bf16.msra.mxu1 %v4633_v35 }
 0x260   :  { %v4126_v7 = vadd.f32 %v2077_v50, %v1499_v21  ;;  %v2079_v60 = vpop.f32.mrb[39].mxu0  ;;  %2470 = vmatmul.mubr.bf16.gmra.mrb[96].mxu1 %v2222_v41  ;;  %v2178_v20 = vmax.f32 %v4122_v39, 0.0  ;;  %v1531_v21 = vadd.f32 %v6433_v6, %v5663_v34 }
 0x261   :  { %v4128_v26 = vadd.f32 %v2079_v60, %v1501_v42  ;;  %v2179_v61 = vmax.f32 %v4124_v36, 0.0 }
 0x262   :  { %v2180_v8 = vmax.f32 %v4126_v7, 0.0  ;;  %v4634_v7 = vld [vmem:[%s6408_s5 + $0x28] sm:$0xff]  }
 0x263   :  { %v2181_v51 = vmax.f32 %v4128_v26, 0.0  ;;  %3971 = vmatprep.subr.bf16.mxu1 %v4634_v7 }
 0x264   :  { %v2224_v43 = vpack.c.bf16 %v2180_v8, %v2178_v20  ;;  %v6434_v20 = vld [vmem:[#allocation6_spill] sm:$0xff]  ;;  %3972 = vmatpush3.bf16.msra.mxu1 %v4634_v7  ;;  %v6445_v7 = vld [vmem:[#allocation17_spill] sm:$0xff] }
 0x265   :  { %v2225_v62 = vpack.c.bf16 %v2181_v51, %v2179_v61  ;;  %v2083_v10 = vpop.f32.mrb[40].mxu0  ;;  %v1535_v8 = vadd.f32 %v6434_v20, %v5661_v28  ;;  %v6435_v51 = vld [vmem:[#allocation7_spill] sm:$0xff] }
 0x266   :  { %v4130_v37 = vadd.f32 %v2083_v10, %v1505_v27  ;;  %v2085_v52 = vpop.f32.mrb[41].mxu0 }
 0x267   :  { %v4132_v38 = vadd.f32 %v2085_v52, %v1507_v9  ;;  %v2087_v53 = vpop.f32.mrb[42].mxu0  ;;  %2477 = vmatprep.mubr.bf16.mxu1 %v2225_v62  ;;  %v1537_v9 = vadd.f32 %v6435_v51, %v5663_v34 }
 0x268   :  { %v4134_v11 = vadd.f32 %v2087_v53, %v1509_v31  ;;  %v2089_v63 = vpop.f32.mrb[43].mxu0  ;;  %2478 = vmatmul.mubr.bf16.gmra.mrb[100].mxu1 %v2224_v43  ;;  %v2182_v49 = vmax.f32 %v4130_v37, 0.0  ;;  %v4635_v31 = vld [vmem:[%s6408_s5 + $0x30] sm:$0xff]   ;;  %v6437_v53 = vld [vmem:[#allocation9_spill] sm:$0xff] }
 0x269   :  { %v4136_v19 = vadd.f32 %v2089_v63, %v1511_v32  ;;  %v2183_v0 = vmax.f32 %v4132_v38, 0.0  ;;  %v6436_v37 = vld [vmem:[#allocation8_spill] sm:$0xff]  ;;  %3973 = vmatprep.subr.bf16.mxu1 %v4635_v31 }
 0x26a   :  { %v2184_v12 = vmax.f32 %v4134_v11, 0.0  ;;  %v1539_v52 = vadd.f32 %v6436_v37, %v5661_v28  ;;  %v1541_v11 = vadd.f32 %v6437_v53, %v5663_v34  ;;  %3974 = vmatpush3.bf16.msra.mxu1 %v4635_v31 }
 0x26b   :  { %v2185_v45 = vmax.f32 %v4136_v19, 0.0 }
 0x26c   :  { %v2226_v22 = vpack.c.bf16 %v2184_v12, %v2182_v49 }
 0x26d   :  { %v2227_v33 = vpack.c.bf16 %v2185_v45, %v2183_v0  ;;  %v2093_v14 = vpop.f32.mrb[44].mxu0  ;;  %v4636_v0 = vld [vmem:[%s6408_s5 + $0x38] sm:$0xff]  }
 0x26e   :  { %v4138_v55 = vadd.f32 %v2093_v14, %v1515_v29  ;;  %v2095_v30 = vpop.f32.mrb[45].mxu0  ;;  %3975 = vmatprep.subr.bf16.mxu1 %v4636_v0 }
 0x26f   :  { %v4140_v46 = vadd.f32 %v2095_v30, %v1517_v13  ;;  %v2097_v24 = vpop.f32.mrb[46].mxu0  ;;  %2485 = vmatprep.mubr.bf16.mxu1 %v2227_v33  ;;  %3976 = vmatpush3.bf16.msra.mxu1 %v4636_v0 }
 0x270   :  { %v4142_v15 = vadd.f32 %v2097_v24, %v1519_v1  ;;  %v2099_v56 = vpop.f32.mrb[47].mxu0  ;;  %2486 = vmatmul.mubr.bf16.gmra.mrb[104].mxu1 %v2226_v22  ;;  %v2186_v40 = vmax.f32 %v4138_v55, 0.0  ;;  %v6438_v22 = vld [vmem:[#allocation10_spill] sm:$0xff]  ;;  %v6439_v55 = vld [vmem:[#allocation11_spill] sm:$0xff] }
 0x271   :  { %v4144_v54 = vadd.f32 %v2099_v56, %v1521_v2  ;;  %v2187_v57 = vmax.f32 %v4140_v46, 0.0  ;;  %v1545_v33 = vadd.f32 %v6438_v22, %v5661_v28  ;;  %v1547_v30 = vadd.f32 %v6439_v55, %v5663_v34 }
 0x272   :  { %v2188_v16 = vmax.f32 %v4142_v15, 0.0  ;;  %v6440_v15 = vld [vmem:[#allocation12_spill] sm:$0xff] }
 0x273   :  { %v2189_v47 = vmax.f32 %v4144_v54, 0.0  ;;  %v1549_v56 = vadd.f32 %v6440_v15, %v5661_v28 }
 0x274   :  { %v2228_v4 = vpack.c.bf16 %v2188_v16, %v2186_v40  ;;  %v6441_v16 = vld [vmem:[#allocation13_spill] sm:$0xff] }
 0x275   :  { %v2229_v58 = vpack.c.bf16 %v2189_v47, %v2187_v57  ;;  %v2103_v18 = vpop.f32.mrb[48].mxu0  ;;  %v1551_v44 = vadd.f32 %v6441_v16, %v5663_v34 }
 0x276   :  { %v4146_v41 = vadd.f32 %v2103_v18, %v1525_v3  ;;  %v2105_v25 = vpop.f32.mrb[49].mxu0  ;;  %v6442_v18 = vld [vmem:[#allocation14_spill] sm:$0xff] }
 0x277   :  { %v4148_v39 = vadd.f32 %v2105_v25, %v1527_v23  ;;  %v2107_v59 = vpop.f32.mrb[50].mxu0  ;;  %2493 = vmatprep.mubr.bf16.mxu1 %v2229_v58  ;;  %v1555_v35 = vadd.f32 %v6442_v18, %v5661_v28 }
 0x278   :  { %v4150_v42 = vadd.f32 %v2107_v59, %v1529_v5  ;;  %v2109_v36 = vpop.f32.mrb[51].mxu0  ;;  %2494 = vmatmul.mubr.bf16.gmra.mrb[108].mxu1 %v2228_v4  ;;  %v2190_v60 = vmax.f32 %v4146_v41, 0.0  ;;  %v6443_v41 = vld [vmem:[#allocation15_spill] sm:$0xff]  ;;  %v6444_v59 = vld [vmem:[#allocation16_spill] sm:$0xff] }
 0x279   :  { %v4152_v50 = vadd.f32 %v2109_v36, %v1531_v21  ;;  %v2191_v27 = vmax.f32 %v4148_v39, 0.0  ;;  %v1557_v25 = vadd.f32 %v6443_v41, %v5663_v34 }
 0x27a   :  { %v2192_v26 = vmax.f32 %v4150_v42, 0.0  ;;  %v1559_v42 = vadd.f32 %v6444_v59, %v5661_v28 }
 0x27b   :  { %v2193_v61 = vmax.f32 %v4152_v50, 0.0 }
 0x27c   :  { %v2230_v43 = vpack.c.bf16 %v2192_v26, %v2190_v60  ;;  %v1561_v60 = vadd.f32 %v6445_v7, %v5663_v34  ;;  %v5820_v34 = vld [vmem:[%s6409_s4] ss:$0 sm:$0xff] }
 0x27d   :  { %v2231_v62 = vpack.c.bf16 %v2193_v61, %v2191_v27  ;;  %v2113_v10 = vpop.f32.mrb[52].mxu0 }
 0x27e   :  { %v4154_v32 = vadd.f32 %v2113_v10, %v1535_v8  ;;  %v2115_v38 = vpop.f32.mrb[53].mxu0 }
 0x27f   :  { %v4156_v63 = vadd.f32 %v2115_v38, %v1537_v9  ;;  %v2117_v19 = vpop.f32.mrb[54].mxu0  ;;  %2501 = vmatprep.mubr.bf16.mxu1 %v2231_v62 }
 0x280   :  { %v4158_v49 = vadd.f32 %v2117_v19, %v1539_v52  ;;  %v2119_v12 = vpop.f32.mrb[55].mxu0  ;;  %2502 = vmatmul.mubr.bf16.gmra.mrb[112].mxu1 %v2230_v43  ;;  %v2194_v45 = vmax.f32 %v4154_v32, 0.0 }
 0x281   :  { %v4160_v29 = vadd.f32 %v2119_v12, %v1541_v11  ;;  %v2195_v14 = vmax.f32 %v4156_v63, 0.0  ;;  %v4637_v63 = vld [vmem:[%s6410_s7] sm:$0xff]  }
 0x282   :  { %v2196_v13 = vmax.f32 %v4158_v49, 0.0  ;;  %4009 = vmatprep.subr.bf16.mxu1 %v4637_v63 }
 0x283   :  { %v2197_v1 = vmax.f32 %v4160_v29, 0.0 }
 0x284   :  { %v2232_v2 = vpack.c.bf16 %v2196_v13, %v2194_v45 }
 0x285   :  { %v2233_v46 = vpack.c.bf16 %v2197_v1, %v2195_v14  ;;  %v2123_v24 = vpop.f32.mrb[56].mxu0 }
 0x286   :  { %v4162_v54 = vadd.f32 %v2123_v24, %v1545_v33  ;;  %v2125_v40 = vpop.f32.mrb[57].mxu0 }
 0x287   :  { %v4164_v3 = vadd.f32 %v2125_v40, %v1547_v30  ;;  %v2127_v57 = vpop.f32.mrb[58].mxu0  ;;  %2509 = vmatprep.mubr.bf16.mxu1 %v2233_v46  ;;  %v4638_v40 = vld [vmem:[%s6410_s7 + $0x8] sm:$0xff]  }
 0x288   :  { %v4166_v47 = vadd.f32 %v2127_v57, %v1549_v56  ;;  %v2129_v17 = vpop.f32.mrb[59].mxu0  ;;  %2510 = vmatmul.mubr.bf16.gmra.mrb[116].mxu1 %v2232_v2  ;;  %v2198_v4 = vmax.f32 %v4162_v54, 0.0 }
 0x289   :  { %v4168_v23 = vadd.f32 %v2129_v17, %v1551_v44  ;;  %v2199_v48 = vmax.f32 %v4164_v3, 0.0 }
 0x28a   :  { %v2200_v58 = vmax.f32 %v4166_v47, 0.0 }
 0x28b   :  { %v2201_v5 = vmax.f32 %v4168_v23, 0.0 }
 0x28c   :  { %v2234_v6 = vpack.c.bf16 %v2200_v58, %v2198_v4 }
 0x28d   :  { %v2235_v21 = vpack.c.bf16 %v2201_v5, %v2199_v48  ;;  %v2133_v39 = vpop.f32.mrb[60].mxu0 }
 0x28e   :  { %v4170_v36 = vadd.f32 %v2133_v39, %v1555_v35  ;;  %v2135_v50 = vpop.f32.mrb[61].mxu0 }
 0x28f   :  { %v4172_v26 = vadd.f32 %v2135_v50, %v1557_v25  ;;  %v2137_v20 = vpop.f32.mrb[62].mxu0  ;;  %2517 = vmatprep.mubr.bf16.mxu1 %v2235_v21 }
 0x290   :  { %v4174_v8 = vadd.f32 %v2137_v20, %v1559_v42  ;;  %v2139_v27 = vpop.f32.mrb[63].mxu0  ;;  %2518 = vmatmul.mubr.bf16.gmra.mrb[120].mxu1 %v2234_v6  ;;  %v2202_v51 = vmax.f32 %v4170_v36, 0.0 }
 0x291   :  { %v4176_v61 = vadd.f32 %v2139_v27, %v1561_v60  ;;  %v2203_v43 = vmax.f32 %v4172_v26, 0.0 }
 0x292   :  { %v2204_v9 = vmax.f32 %v4174_v8, 0.0 }
 0x293   :  { %v2205_v62 = vmax.f32 %v4176_v61, 0.0 }
 0x294   :  { %v2236_v10 = vpack.c.bf16 %v2204_v9, %v2202_v51 }
 0x295   :  { %v2237_v31 = vpack.c.bf16 %v2205_v62, %v2203_v43 }
 0x297   :  { %2525 = vmatprep.mubr.bf16.mxu1 %v2237_v31 }
 0x298   :  { %2526 = vmatmul.mubr.bf16.gmra.mrb[124].mxu1 %v2236_v10 }
 0x2f3   :  { %v3821_v28 = vpop.f32.mrb[64].mxu1 }
 0x2f4   :  { %v3822_v37 = vpop.f32.mrb[65].mxu1 }
 0x2f5   :  { %v3823_v52 = vadd.f32 %v3822_v37, %v3821_v28  ;;  %v3824_v32 = vpop.f32.mrb[66].mxu1 }
 0x2f6   :  { %v3825_v38 = vpop.f32.mrb[67].mxu1 }
 0x2f7   :  { %v2408_v53 = vadd.f32 %v3823_v52, %v5820_v34  ;;  %v3826_v11 = vadd.f32 %v3825_v38, %v3824_v32 }
 0x2f9   :  { %v2411_v19 = vadd.f32 %v3826_v11, %v5820_v34  ;;  %v2534_v49 = vmax.f32 %v2408_v53, 0.0 }
 0x2fb   :  { %v2535_v12 = vmax.f32 %v2411_v19, 0.0  ;;  %v3827_v29 = vpop.f32.mrb[68].mxu1 }
 0x2fc   :  { %v3828_v0 = vpop.f32.mrb[69].mxu1 }
 0x2fd   :  { %v3829_v45 = vadd.f32 %v3828_v0, %v3827_v29  ;;  %v3830_v13 = vpop.f32.mrb[70].mxu1  ;;  %v2566_v22 = vpack.c.bf16 %v2535_v12, %v2534_v49 }
 0x2fe   :  { %v3831_v33 = vpop.f32.mrb[71].mxu1 }
 0x2ff   :  { %v2416_v14 = vadd.f32 %v3829_v45, %v5820_v34  ;;  %v3832_v1 = vadd.f32 %v3831_v33, %v3830_v13  ;;  %3977 = vmatprep.mubr.bf16.mxu1 %v2566_v22 }
 0x301   :  { %v2419_v55 = vadd.f32 %v3832_v1, %v5820_v34  ;;  %v2536_v30 = vmax.f32 %v2416_v14, 0.0 }
 0x303   :  { %v2537_v2 = vmax.f32 %v2419_v55, 0.0  ;;  %v3833_v46 = vpop.f32.mrb[72].mxu1 }
 0x304   :  { %v3834_v24 = vpop.f32.mrb[73].mxu1 }
 0x305   :  { %v2567_v15 = vpack.c.bf16 %v2537_v2, %v2536_v30  ;;  %v3835_v56 = vadd.f32 %v3834_v24, %v3833_v46  ;;  %v3836_v54 = vpop.f32.mrb[74].mxu1 }
 0x306   :  { %v3837_v16 = vpop.f32.mrb[75].mxu1 }
 0x307   :  { %v2424_v44 = vadd.f32 %v3835_v56, %v5820_v34  ;;  %v3838_v3 = vadd.f32 %v3837_v16, %v3836_v54  ;;  %3978 = vmatmul.mubr.bf16.vlgmr.msra.gmra.mrb[128].mxu1 %v2567_v15 }
 0x308   :  { %4010 = vmatpush3.bf16.msra.mxu1 %v4637_v63 }
 0x309   :  { %v2427_v57 = vadd.f32 %v3838_v3, %v5820_v34  ;;  %4011 = vmatprep.subr.bf16.mxu1 %v4638_v40  ;;  %v2538_v47 = vmax.f32 %v2424_v44, 0.0 }
 0x30b   :  { %v2539_v17 = vmax.f32 %v2427_v57, 0.0  ;;  %v3839_v23 = vpop.f32.mrb[76].mxu1 }
 0x30c   :  { %v3840_v4 = vpop.f32.mrb[77].mxu1  ;;  %4012 = vmatpush3.bf16.msra.mxu1 %v4638_v40 }
 0x30d   :  { %v3841_v58 = vadd.f32 %v3840_v4, %v3839_v23  ;;  %v3842_v18 = vpop.f32.mrb[78].mxu1  ;;  %v2568_v35 = vpack.c.bf16 %v2539_v17, %v2538_v47 }
 0x30e   :  { %v3843_v48 = vpop.f32.mrb[79].mxu1 }
 0x30f   :  { %v2432_v5 = vadd.f32 %v3841_v58, %v5820_v34  ;;  %v3844_v41 = vadd.f32 %v3843_v48, %v3842_v18  ;;  %3981 = vmatprep.mubr.bf16.mxu1 %v2568_v35 }
 0x311   :  { %v2435_v25 = vadd.f32 %v3844_v41, %v5820_v34  ;;  %v2540_v6 = vmax.f32 %v2432_v5, 0.0 }
 0x313   :  { %v2541_v21 = vmax.f32 %v2435_v25, 0.0  ;;  %v3845_v39 = vpop.f32.mrb[80].mxu1 }
 0x314   :  { %v3846_v59 = vpop.f32.mrb[81].mxu1 }
 0x315   :  { %v3847_v42 = vadd.f32 %v3846_v59, %v3845_v39  ;;  %v3848_v36 = vpop.f32.mrb[82].mxu1  ;;  %v2569_v50 = vpack.c.bf16 %v2541_v21, %v2540_v6 }
 0x316   :  { %v3849_v7 = vpop.f32.mrb[83].mxu1 }
 0x317   :  { %v2440_v60 = vadd.f32 %v3847_v42, %v5820_v34  ;;  %v3850_v26 = vadd.f32 %v3849_v7, %v3848_v36  ;;  %3982 = vmatmul.mubr.bf16.gmra.mrb[132].mxu1 %v2569_v50 }
 0x319   :  { %v2443_v20 = vadd.f32 %v3850_v26, %v5820_v34  ;;  %v2542_v8 = vmax.f32 %v2440_v60, 0.0 }
 0x31b   :  { %v2543_v27 = vmax.f32 %v2443_v20, 0.0  ;;  %v3851_v61 = vpop.f32.mrb[84].mxu1 }
 0x31c   :  { %v3852_v51 = vpop.f32.mrb[85].mxu1 }
 0x31d   :  { %v3853_v9 = vadd.f32 %v3852_v51, %v3851_v61  ;;  %v3854_v43 = vpop.f32.mrb[86].mxu1  ;;  %v2570_v62 = vpack.c.bf16 %v2543_v27, %v2542_v8 }
 0x31e   :  { %v3855_v10 = vpop.f32.mrb[87].mxu1 }
 0x31f   :  { %v2448_v31 = vadd.f32 %v3853_v9, %v5820_v34  ;;  %v3856_v28 = vadd.f32 %v3855_v10, %v3854_v43  ;;  %3985 = vmatprep.mubr.bf16.mxu1 %v2570_v62 }
 0x321   :  { %v2451_v37 = vadd.f32 %v3856_v28, %v5820_v34  ;;  %v2544_v52 = vmax.f32 %v2448_v31, 0.0 }
 0x323   :  { %v2545_v32 = vmax.f32 %v2451_v37, 0.0  ;;  %v3857_v38 = vpop.f32.mrb[88].mxu1 }
 0x324   :  { %v3858_v53 = vpop.f32.mrb[89].mxu1 }
 0x325   :  { %v3859_v11 = vadd.f32 %v3858_v53, %v3857_v38  ;;  %v3860_v63 = vpop.f32.mrb[90].mxu1  ;;  %v2571_v19 = vpack.c.bf16 %v2545_v32, %v2544_v52 }
 0x326   :  { %v3861_v49 = vpop.f32.mrb[91].mxu1 }
 0x327   :  { %v2456_v12 = vadd.f32 %v3859_v11, %v5820_v34  ;;  %v3862_v29 = vadd.f32 %v3861_v49, %v3860_v63  ;;  %3986 = vmatmul.mubr.bf16.gmra.mrb[136].mxu1 %v2571_v19 }
 0x329   :  { %v2459_v0 = vadd.f32 %v3862_v29, %v5820_v34  ;;  %v2546_v45 = vmax.f32 %v2456_v12, 0.0 }
 0x32b   :  { %v2547_v13 = vmax.f32 %v2459_v0, 0.0  ;;  %v3863_v22 = vpop.f32.mrb[92].mxu1 }
 0x32c   :  { %v3864_v33 = vpop.f32.mrb[93].mxu1 }
 0x32d   :  { %v3865_v14 = vadd.f32 %v3864_v33, %v3863_v22  ;;  %v3866_v1 = vpop.f32.mrb[94].mxu1  ;;  %v2572_v55 = vpack.c.bf16 %v2547_v13, %v2546_v45 }
 0x32e   :  { %v3867_v30 = vpop.f32.mrb[95].mxu1 }
 0x32f   :  { %v2464_v2 = vadd.f32 %v3865_v14, %v5820_v34  ;;  %v3868_v46 = vadd.f32 %v3867_v30, %v3866_v1  ;;  %3989 = vmatprep.mubr.bf16.mxu1 %v2572_v55  ;;  %v4639_v55 = vld [vmem:[%s6410_s7 + $0x10] sm:$0xff]  }
 0x330   :  { %4013 = vmatprep.subr.bf16.mxu1 %v4639_v55 }
 0x331   :  { %v2467_v24 = vadd.f32 %v3868_v46, %v5820_v34  ;;  %v2548_v15 = vmax.f32 %v2464_v2, 0.0  ;;  %4014 = vmatpush3.bf16.msra.mxu1 %v4639_v55 }
 0x333   :  { %v2549_v56 = vmax.f32 %v2467_v24, 0.0  ;;  %v3869_v54 = vpop.f32.mrb[96].mxu1 }
 0x334   :  { %v3870_v40 = vpop.f32.mrb[97].mxu1 }
 0x335   :  { %v3871_v16 = vadd.f32 %v3870_v40, %v3869_v54  ;;  %v3872_v44 = vpop.f32.mrb[98].mxu1  ;;  %v2573_v3 = vpack.c.bf16 %v2549_v56, %v2548_v15  ;;  %v4640_v40 = vld [vmem:[%s6410_s7 + $0x18] sm:$0xff]  }
 0x336   :  { %v3873_v57 = vpop.f32.mrb[99].mxu1  ;;  %4015 = vmatprep.subr.bf16.mxu1 %v4640_v40 }
 0x337   :  { %v2472_v47 = vadd.f32 %v3871_v16, %v5820_v34  ;;  %v3874_v17 = vadd.f32 %v3873_v57, %v3872_v44  ;;  %3990 = vmatmul.mubr.bf16.gmra.mrb[140].mxu1 %v2573_v3 }
 0x338   :  { %4016 = vmatpush3.bf16.msra.mxu1 %v4640_v40 }
 0x339   :  { %v2475_v23 = vadd.f32 %v3874_v17, %v5820_v34  ;;  %v2550_v4 = vmax.f32 %v2472_v47, 0.0 }
 0x33b   :  { %v2551_v58 = vmax.f32 %v2475_v23, 0.0  ;;  %v3875_v18 = vpop.f32.mrb[100].mxu1 }
 0x33c   :  { %v3876_v35 = vpop.f32.mrb[101].mxu1 }
 0x33d   :  { %v3877_v48 = vadd.f32 %v3876_v35, %v3875_v18  ;;  %v3878_v5 = vpop.f32.mrb[102].mxu1  ;;  %v2574_v41 = vpack.c.bf16 %v2551_v58, %v2550_v4 }
 0x33e   :  { %v3879_v25 = vpop.f32.mrb[103].mxu1 }
 0x33f   :  { %v2480_v6 = vadd.f32 %v3877_v48, %v5820_v34  ;;  %v3880_v21 = vadd.f32 %v3879_v25, %v3878_v5  ;;  %3993 = vmatprep.mubr.bf16.mxu1 %v2574_v41 }
 0x341   :  { %v2483_v39 = vadd.f32 %v3880_v21, %v5820_v34  ;;  %v2552_v59 = vmax.f32 %v2480_v6, 0.0 }
 0x343   :  { %v2553_v42 = vmax.f32 %v2483_v39, 0.0  ;;  %v3881_v36 = vpop.f32.mrb[104].mxu1 }
 0x344   :  { %v3882_v50 = vpop.f32.mrb[105].mxu1 }
 0x345   :  { %v3883_v7 = vadd.f32 %v3882_v50, %v3881_v36  ;;  %v3884_v60 = vpop.f32.mrb[106].mxu1  ;;  %v2575_v26 = vpack.c.bf16 %v2553_v42, %v2552_v59 }
 0x346   :  { %v3885_v20 = vpop.f32.mrb[107].mxu1 }
 0x347   :  { %v2488_v8 = vadd.f32 %v3883_v7, %v5820_v34  ;;  %v3886_v27 = vadd.f32 %v3885_v20, %v3884_v60  ;;  %3994 = vmatmul.mubr.bf16.gmra.mrb[144].mxu1 %v2575_v26 }
 0x349   :  { %v2491_v61 = vadd.f32 %v3886_v27, %v5820_v34  ;;  %v2554_v51 = vmax.f32 %v2488_v8, 0.0  ;;  %v5869_v8 = vld [vmem:[%s6411_s6] ss:$0 sm:$0xff] }
 0x34b   :  { %v2555_v9 = vmax.f32 %v2491_v61, 0.0  ;;  %v3887_v43 = vpop.f32.mrb[108].mxu1 }
 0x34c   :  { %v3888_v62 = vpop.f32.mrb[109].mxu1 }
 0x34d   :  { %v3889_v10 = vadd.f32 %v3888_v62, %v3887_v43  ;;  %v3890_v31 = vpop.f32.mrb[110].mxu1  ;;  %v2576_v28 = vpack.c.bf16 %v2555_v9, %v2554_v51 }
 0x34e   :  { %v3891_v37 = vpop.f32.mrb[111].mxu1 }
 0x34f   :  { %v2496_v52 = vadd.f32 %v3889_v10, %v5820_v34  ;;  %v3892_v32 = vadd.f32 %v3891_v37, %v3890_v31  ;;  %3997 = vmatprep.mubr.bf16.mxu1 %v2576_v28 }
 0x351   :  { %v2499_v38 = vadd.f32 %v3892_v32, %v5820_v34  ;;  %v2556_v53 = vmax.f32 %v2496_v52, 0.0 }
 0x353   :  { %v2557_v11 = vmax.f32 %v2499_v38, 0.0  ;;  %v3893_v63 = vpop.f32.mrb[112].mxu1 }
 0x354   :  { %v3894_v19 = vpop.f32.mrb[113].mxu1 }
 0x355   :  { %v3895_v49 = vadd.f32 %v3894_v19, %v3893_v63  ;;  %v3896_v12 = vpop.f32.mrb[114].mxu1  ;;  %v2577_v29 = vpack.c.bf16 %v2557_v11, %v2556_v53 }
 0x356   :  { %v3897_v0 = vpop.f32.mrb[115].mxu1 }
 0x357   :  { %v2504_v45 = vadd.f32 %v3895_v49, %v5820_v34  ;;  %v3898_v13 = vadd.f32 %v3897_v0, %v3896_v12  ;;  %3998 = vmatmul.mubr.bf16.gmra.mrb[148].mxu1 %v2577_v29 }
 0x359   :  { %v2507_v22 = vadd.f32 %v3898_v13, %v5820_v34  ;;  %v2558_v33 = vmax.f32 %v2504_v45, 0.0 }
 0x35b   :  { %v2559_v14 = vmax.f32 %v2507_v22, 0.0  ;;  %v3899_v1 = vpop.f32.mrb[116].mxu1 }
 0x35c   :  { %v3900_v30 = vpop.f32.mrb[117].mxu1 }
 0x35d   :  { %v3901_v2 = vadd.f32 %v3900_v30, %v3899_v1  ;;  %v3902_v46 = vpop.f32.mrb[118].mxu1  ;;  %v2578_v24 = vpack.c.bf16 %v2559_v14, %v2558_v33 }
 0x35e   :  { %v3903_v15 = vpop.f32.mrb[119].mxu1 }
 0x35f   :  { %v2512_v56 = vadd.f32 %v3901_v2, %v5820_v34  ;;  %v3904_v54 = vadd.f32 %v3903_v15, %v3902_v46  ;;  %4001 = vmatprep.mubr.bf16.mxu1 %v2578_v24 }
 0x361   :  { %v2515_v16 = vadd.f32 %v3904_v54, %v5820_v34  ;;  %v2560_v44 = vmax.f32 %v2512_v56, 0.0 }
 0x363   :  { %v2561_v3 = vmax.f32 %v2515_v16, 0.0  ;;  %v3905_v57 = vpop.f32.mrb[120].mxu1 }
 0x364   :  { %v3906_v47 = vpop.f32.mrb[121].mxu1 }
 0x365   :  { %v3907_v17 = vadd.f32 %v3906_v47, %v3905_v57  ;;  %v3908_v23 = vpop.f32.mrb[122].mxu1  ;;  %v2579_v4 = vpack.c.bf16 %v2561_v3, %v2560_v44 }
 0x366   :  { %v3909_v58 = vpop.f32.mrb[123].mxu1 }
 0x367   :  { %v2520_v18 = vadd.f32 %v3907_v17, %v5820_v34  ;;  %v3910_v35 = vadd.f32 %v3909_v58, %v3908_v23  ;;  %4002 = vmatmul.mubr.bf16.gmra.mrb[152].mxu1 %v2579_v4 }
 0x369   :  { %v2523_v48 = vadd.f32 %v3910_v35, %v5820_v34  ;;  %v2562_v5 = vmax.f32 %v2520_v18, 0.0 }
 0x36b   :  { %v2563_v41 = vmax.f32 %v2523_v48, 0.0  ;;  %v3911_v25 = vpop.f32.mrb[124].mxu1 }
 0x36c   :  { %v3912_v6 = vpop.f32.mrb[125].mxu1 }
 0x36d   :  { %v3913_v21 = vadd.f32 %v3912_v6, %v3911_v25  ;;  %v3914_v39 = vpop.f32.mrb[126].mxu1  ;;  %v2580_v59 = vpack.c.bf16 %v2563_v41, %v2562_v5 }
 0x36e   :  { %v3915_v42 = vpop.f32.mrb[127].mxu1 }
 0x36f   :  { %v2528_v36 = vadd.f32 %v3913_v21, %v5820_v34  ;;  %v3916_v50 = vadd.f32 %v3915_v42, %v3914_v39  ;;  %4005 = vmatprep.mubr.bf16.mxu1 %v2580_v59 }
 0x371   :  { %v2531_v7 = vadd.f32 %v3916_v50, %v5820_v34  ;;  %v2564_v60 = vmax.f32 %v2528_v36, 0.0 }
 0x373   :  { %v2565_v26 = vmax.f32 %v2531_v7, 0.0 }
 0x375   :  { %v2581_v20 = vpack.c.bf16 %v2565_v26, %v2564_v60 }
 0x377   :  { %4006 = vmatmul.mubr.bf16.gmra.mrb[156].mxu1 %v2581_v20 }
 0x3da   :  { %v3979_v27 = vpop.f32.mrb[128].mxu1 }
 0x3db   :  { %v2696_v61 = vadd.f32 %v3979_v27, %v5869_v8  ;;  %v2687_v51 = vpop.f32.mrb[129].mxu1 }
 0x3dc   :  { %v2688_v9 = vadd.f32 %v5869_v8, %v2687_v51  ;;  %v3980_v43 = vpop.f32.mrb[130].mxu1 }
 0x3dd   :  { %v2699_v62 = vadd.f32 %v3980_v43, %v5869_v8  ;;  %v2690_v10 = vpop.f32.mrb[131].mxu1  ;;  %v2816_v31 = vmax.f32 %v2696_v61, 0.0 }
 0x3de   :  { %v2691_v34 = vadd.f32 %v5869_v8, %v2690_v10  ;;  %v2814_v37 = vmax.f32 %v2688_v9, 0.0 }
 0x3df   :  { %v2817_v28 = vmax.f32 %v2699_v62, 0.0 }
 0x3e0   :  { %v2815_v52 = vmax.f32 %v2691_v34, 0.0 }
 0x3e1   :  { %v2847_v32 = vpack.c.bf16 %v2817_v28, %v2816_v31 }
 0x3e2   :  { %v2846_v38 = vpack.c.bf16 %v2815_v52, %v2814_v37 }
 0x3e4   :  { %4017 = vmatprep.mubr.msk.bf16.mxu1 %vm2901_vm1, %v2846_v38 }
 0x3e5   :  { %4018 = vmatmul.mubr.msk.bf16.vlgmr.msra.gmra.mrb[160].mxu1 %vm2901_vm1, %v2847_v32 }
 0x3ea   :  { %v3983_v53 = vpop.f32.mrb[132].mxu1 }
 0x3eb   :  { %v2712_v11 = vadd.f32 %v3983_v53, %v5869_v8  ;;  %v2703_v63 = vpop.f32.mrb[133].mxu1 }
 0x3ec   :  { %v2704_v19 = vadd.f32 %v5869_v8, %v2703_v63  ;;  %v3984_v49 = vpop.f32.mrb[134].mxu1 }
 0x3ed   :  { %v2715_v12 = vadd.f32 %v3984_v49, %v5869_v8  ;;  %v2706_v29 = vpop.f32.mrb[135].mxu1  ;;  %v2820_v45 = vmax.f32 %v2712_v11, 0.0 }
 0x3ee   :  { %v2707_v0 = vadd.f32 %v5869_v8, %v2706_v29  ;;  %v2818_v22 = vmax.f32 %v2704_v19, 0.0 }
 0x3ef   :  { %v2821_v13 = vmax.f32 %v2715_v12, 0.0 }
 0x3f0   :  { %v2819_v33 = vmax.f32 %v2707_v0, 0.0 }
 0x3f1   :  { %v2849_v14 = vpack.c.bf16 %v2821_v13, %v2820_v45 }
 0x3f2   :  { %v2848_v1 = vpack.c.bf16 %v2819_v33, %v2818_v22 }
 0x3f4   :  { %4021 = vmatprep.mubr.msk.bf16.mxu1 %vm2901_vm1, %v2848_v1 }
 0x3f5   :  { %4022 = vmatmul.mubr.msk.bf16.gmra.mrb[164].mxu1 %vm2901_vm1, %v2849_v14 }
 0x3fa   :  { %v3987_v55 = vpop.f32.mrb[136].mxu1 }
 0x3fb   :  { %v2728_v30 = vadd.f32 %v3987_v55, %v5869_v8  ;;  %v2719_v2 = vpop.f32.mrb[137].mxu1 }
 0x3fc   :  { %v2720_v46 = vadd.f32 %v5869_v8, %v2719_v2  ;;  %v3988_v24 = vpop.f32.mrb[138].mxu1 }
 0x3fd   :  { %v2731_v15 = vadd.f32 %v3988_v24, %v5869_v8  ;;  %v2722_v56 = vpop.f32.mrb[139].mxu1  ;;  %v2824_v40 = vmax.f32 %v2728_v30, 0.0 }
 0x3fe   :  { %v2723_v54 = vadd.f32 %v5869_v8, %v2722_v56  ;;  %v2822_v44 = vmax.f32 %v2720_v46, 0.0 }
 0x3ff   :  { %v2825_v16 = vmax.f32 %v2731_v15, 0.0 }
 0x400   :  { %v2823_v3 = vmax.f32 %v2723_v54, 0.0 }
 0x401   :  { %v2851_v57 = vpack.c.bf16 %v2825_v16, %v2824_v40 }
 0x402   :  { %v2850_v47 = vpack.c.bf16 %v2823_v3, %v2822_v44 }
 0x404   :  { %4025 = vmatprep.mubr.msk.bf16.mxu1 %vm2901_vm1, %v2850_v47 }
 0x405   :  { %4026 = vmatmul.mubr.msk.bf16.gmra.mrb[168].mxu1 %vm2901_vm1, %v2851_v57 }
 0x40a   :  { %v3991_v17 = vpop.f32.mrb[140].mxu1 }
 0x40b   :  { %v2744_v23 = vadd.f32 %v3991_v17, %v5869_v8  ;;  %v2735_v4 = vpop.f32.mrb[141].mxu1 }
 0x40c   :  { %v2736_v58 = vadd.f32 %v5869_v8, %v2735_v4  ;;  %v3992_v18 = vpop.f32.mrb[142].mxu1 }
 0x40d   :  { %v2747_v35 = vadd.f32 %v3992_v18, %v5869_v8  ;;  %v2738_v48 = vpop.f32.mrb[143].mxu1  ;;  %v2828_v41 = vmax.f32 %v2744_v23, 0.0 }
 0x40e   :  { %v2739_v5 = vadd.f32 %v5869_v8, %v2738_v48  ;;  %v2826_v6 = vmax.f32 %v2736_v58, 0.0 }
 0x40f   :  { %v2829_v25 = vmax.f32 %v2747_v35, 0.0 }
 0x410   :  { %v2827_v21 = vmax.f32 %v2739_v5, 0.0  ;;  %v5922_v5 = vld [vmem:[%s6412_s8] ss:$0 sm:$0xff] }
 0x411   :  { %v2853_v39 = vpack.c.bf16 %v2829_v25, %v2828_v41 }
 0x412   :  { %v2852_v59 = vpack.c.bf16 %v2827_v21, %v2826_v6 }
 0x414   :  { %4029 = vmatprep.mubr.msk.bf16.mxu1 %vm2901_vm1, %v2852_v59 }
 0x415   :  { %4030 = vmatmul.mubr.msk.bf16.gmra.mrb[172].mxu1 %vm2901_vm1, %v2853_v39 }
 0x41a   :  { %v3995_v42 = vpop.f32.mrb[144].mxu1 }
 0x41b   :  { %v2760_v36 = vadd.f32 %v3995_v42, %v5869_v8  ;;  %v2751_v50 = vpop.f32.mrb[145].mxu1 }
 0x41c   :  { %v2752_v7 = vadd.f32 %v5869_v8, %v2751_v50  ;;  %v3996_v60 = vpop.f32.mrb[146].mxu1 }
 0x41d   :  { %v2763_v26 = vadd.f32 %v3996_v60, %v5869_v8  ;;  %v2754_v20 = vpop.f32.mrb[147].mxu1  ;;  %v2832_v61 = vmax.f32 %v2760_v36, 0.0 }
 0x41e   :  { %v2755_v27 = vadd.f32 %v5869_v8, %v2754_v20  ;;  %v2830_v9 = vmax.f32 %v2752_v7, 0.0 }
 0x41f   :  { %v2833_v51 = vmax.f32 %v2763_v26, 0.0 }
 0x420   :  { %v2831_v43 = vmax.f32 %v2755_v27, 0.0 }
 0x421   :  { %v2855_v62 = vpack.c.bf16 %v2833_v51, %v2832_v61 }
 0x422   :  { %v2854_v10 = vpack.c.bf16 %v2831_v43, %v2830_v9 }
 0x424   :  { %4033 = vmatprep.mubr.msk.bf16.mxu1 %vm2901_vm1, %v2854_v10 }
 0x425   :  { %4034 = vmatmul.mubr.msk.bf16.gmra.mrb[176].mxu1 %vm2901_vm1, %v2855_v62 }
 0x42a   :  { %v3999_v34 = vpop.f32.mrb[148].mxu1 }
 0x42b   :  { %v2776_v31 = vadd.f32 %v3999_v34, %v5869_v8  ;;  %v2767_v28 = vpop.f32.mrb[149].mxu1 }
 0x42c   :  { %v2768_v37 = vadd.f32 %v5869_v8, %v2767_v28  ;;  %v4000_v52 = vpop.f32.mrb[150].mxu1 }
 0x42d   :  { %v2779_v32 = vadd.f32 %v4000_v52, %v5869_v8  ;;  %v2770_v38 = vpop.f32.mrb[151].mxu1  ;;  %v2836_v11 = vmax.f32 %v2776_v31, 0.0 }
 0x42e   :  { %v2771_v53 = vadd.f32 %v5869_v8, %v2770_v38  ;;  %v2834_v19 = vmax.f32 %v2768_v37, 0.0 }
 0x42f   :  { %v2837_v63 = vmax.f32 %v2779_v32, 0.0 }
 0x430   :  { %v2835_v49 = vmax.f32 %v2771_v53, 0.0 }
 0x431   :  { %v2857_v12 = vpack.c.bf16 %v2837_v63, %v2836_v11 }
 0x432   :  { %v2856_v29 = vpack.c.bf16 %v2835_v49, %v2834_v19 }
 0x434   :  { %4037 = vmatprep.mubr.msk.bf16.mxu1 %vm2901_vm1, %v2856_v29 }
 0x435   :  { %4038 = vmatmul.mubr.msk.bf16.gmra.mrb[180].mxu1 %vm2901_vm1, %v2857_v12 }
 0x43a   :  { %v4003_v0 = vpop.f32.mrb[152].mxu1 }
 0x43b   :  { %v2792_v45 = vadd.f32 %v4003_v0, %v5869_v8  ;;  %v2783_v13 = vpop.f32.mrb[153].mxu1 }
 0x43c   :  { %v2784_v22 = vadd.f32 %v5869_v8, %v2783_v13  ;;  %v4004_v33 = vpop.f32.mrb[154].mxu1 }
 0x43d   :  { %v2795_v14 = vadd.f32 %v4004_v33, %v5869_v8  ;;  %v2786_v1 = vpop.f32.mrb[155].mxu1  ;;  %v2840_v30 = vmax.f32 %v2792_v45, 0.0 }
 0x43e   :  { %v2787_v55 = vadd.f32 %v5869_v8, %v2786_v1  ;;  %v2838_v46 = vmax.f32 %v2784_v22, 0.0 }
 0x43f   :  { %v2841_v2 = vmax.f32 %v2795_v14, 0.0 }
 0x440   :  { %v2839_v24 = vmax.f32 %v2787_v55, 0.0 }
 0x441   :  { %v2859_v15 = vpack.c.bf16 %v2841_v2, %v2840_v30 }
 0x442   :  { %v2858_v56 = vpack.c.bf16 %v2839_v24, %v2838_v46 }
 0x444   :  { %4041 = vmatprep.mubr.msk.bf16.mxu1 %vm2901_vm1, %v2858_v56 }
 0x445   :  { %4042 = vmatmul.mubr.msk.bf16.gmra.mrb[184].mxu1 %vm2901_vm1, %v2859_v15 }
 0x44a   :  { %v4007_v54 = vpop.f32.mrb[156].mxu1 }
 0x44b   :  { %v2808_v40 = vadd.f32 %v4007_v54, %v5869_v8  ;;  %v2799_v16 = vpop.f32.mrb[157].mxu1 }
 0x44c   :  { %v2800_v44 = vadd.f32 %v5869_v8, %v2799_v16  ;;  %v4008_v3 = vpop.f32.mrb[158].mxu1 }
 0x44d   :  { %v2811_v57 = vadd.f32 %v4008_v3, %v5869_v8  ;;  %v2802_v47 = vpop.f32.mrb[159].mxu1  ;;  %v2844_v23 = vmax.f32 %v2808_v40, 0.0 }
 0x44e   :  { %v2803_v17 = vadd.f32 %v5869_v8, %v2802_v47  ;;  %v2842_v58 = vmax.f32 %v2800_v44, 0.0 }
 0x44f   :  { %v2845_v4 = vmax.f32 %v2811_v57, 0.0 }
 0x450   :  { %v2843_v18 = vmax.f32 %v2803_v17, 0.0 }
 0x451   :  { %v2861_v35 = vpack.c.bf16 %v2845_v4, %v2844_v23 }
 0x452   :  { %v2860_v48 = vpack.c.bf16 %v2843_v18, %v2842_v58 }
 0x454   :  { %4045 = vmatprep.mubr.msk.bf16.mxu1 %vm2901_vm1, %v2860_v48 }
 0x455   :  { %4046 = vmatmul.mubr.msk.bf16.gmra.mrb[188].mxu1 %vm2901_vm1, %v2861_v35 }
 0x4b8   :  { %v4019_v41 = vpop.f32.mrb[160].mxu1 }
 0x4b9   :  { %v5925_v25 = vadd.f32 %v4019_v41, %v5922_v5  ;;  %v2984_v8 = vpop.f32.mrb[161].mxu1 }
 0x4ba   :  { %v5928_v6 = vadd.f32 %v5922_v5, %v2984_v8  ;;  %v4020_v21 = vpop.f32.mrb[162].mxu1 }
 0x4bb   :  { %v5931_v39 = vadd.f32 %v4020_v21, %v5922_v5  ;;  %v2987_v59 = vpop.f32.mrb[163].mxu1  ;;  %v3118_v42 = vsel %vm3111_vm2, %v5925_v25, -inf }
 0x4bc   :  { %v5936_v36 = vadd.f32 %v5922_v5, %v2987_v59  ;;  %3119 = vmax.xlane.f32.xlu1 %v3118_v42  ;;  %v3112_v50 = vsel %vm3111_vm2, %v5928_v6, -inf }
 0x4bd   :  { %3113 = vmax.xlane.f32.xlu0 %v3112_v50  ;;  %v3121_v7 = vsel %vm3111_vm2, %v5931_v39, -inf }
 0x4be   :  { %v3115_v60 = vsel %vm3111_vm2, %v5936_v36, -inf }
 0x4c0   :  { %3122 = vmax.xlane.f32.xlu1 %v3121_v7 }
 0x4c1   :  { %3116 = vmax.xlane.f32.xlu0 %v3115_v60 }
 0x4c8   :  { %v4023_v26 = vpop.f32.mrb[164].mxu1 }
 0x4c9   :  { %v5945_v20 = vadd.f32 %v4023_v26, %v5922_v5  ;;  %v3000_v27 = vpop.f32.mrb[165].mxu1 }
 0x4ca   :  { %v4024_v61 = vpop.f32.mrb[166].mxu1  ;;  %v5948_v51 = vadd.f32 %v5922_v5, %v3000_v27 }
 0x4cb   :  { %v5951_v9 = vadd.f32 %v4024_v61, %v5922_v5  ;;  %v3003_v43 = vpop.f32.mrb[167].mxu1  ;;  %v3130_v62 = vsel %vm3111_vm2, %v5945_v20, -inf }
 0x4cc   :  { %3131 = vmax.xlane.f32.xlu0 %v3130_v62  ;;  %v5956_v10 = vadd.f32 %v5922_v5, %v3003_v43  ;;  %v3124_v31 = vsel %vm3111_vm2, %v5948_v51, -inf }
 0x4cd   :  { %v3133_v34 = vsel %vm3111_vm2, %v5951_v9, -inf }
 0x4ce   :  { %3134 = vmax.xlane.f32.xlu1 %v3133_v34  ;;  %v3127_v28 = vsel %vm3111_vm2, %v5956_v10, -inf }
 0x4d0   :  { %3125 = vmax.xlane.f32.xlu0 %v3124_v31 }
 0x4d2   :  { %3128 = vmax.xlane.f32.xlu1 %v3127_v28 }
 0x4d8   :  { %v4027_v37 = vpop.f32.mrb[168].mxu1 }
 0x4d9   :  { %v5965_v52 = vadd.f32 %v4027_v37, %v5922_v5  ;;  %v3016_v32 = vpop.f32.mrb[169].mxu1 }
 0x4da   :  { %v4028_v38 = vpop.f32.mrb[170].mxu1  ;;  %v5968_v53 = vadd.f32 %v5922_v5, %v3016_v32 }
 0x4db   :  { %v5971_v11 = vadd.f32 %v4028_v38, %v5922_v5  ;;  %v3019_v63 = vpop.f32.mrb[171].mxu1  ;;  %v3142_v19 = vsel %vm3111_vm2, %v5965_v52, -inf }
 0x4dc   :  { %3143 = vmax.xlane.f32.xlu0 %v3142_v19  ;;  %v5976_v49 = vadd.f32 %v5922_v5, %v3019_v63  ;;  %v3136_v29 = vsel %vm3111_vm2, %v5968_v53, -inf }
 0x4dd   :  { %v3145_v12 = vsel %vm3111_vm2, %v5971_v11, -inf }
 0x4de   :  { %3146 = vmax.xlane.f32.xlu1 %v3145_v12  ;;  %v3139_v0 = vsel %vm3111_vm2, %v5976_v49, -inf }
 0x4e0   :  { %3137 = vmax.xlane.f32.xlu0 %v3136_v29 }
 0x4e2   :  { %3140 = vmax.xlane.f32.xlu1 %v3139_v0 }
 0x4e8   :  { %v4031_v45 = vpop.f32.mrb[172].mxu1 }
 0x4e9   :  { %v5985_v13 = vadd.f32 %v4031_v45, %v5922_v5  ;;  %v3032_v22 = vpop.f32.mrb[173].mxu1 }
 0x4ea   :  { %v4032_v33 = vpop.f32.mrb[174].mxu1  ;;  %v5988_v14 = vadd.f32 %v5922_v5, %v3032_v22 }
 0x4eb   :  { %v5991_v1 = vadd.f32 %v4032_v33, %v5922_v5  ;;  %v3035_v55 = vpop.f32.mrb[175].mxu1  ;;  %v3154_v30 = vsel %vm3111_vm2, %v5985_v13, -inf }
 0x4ec   :  { %3155 = vmax.xlane.f32.xlu0 %v3154_v30  ;;  %v5996_v2 = vadd.f32 %v5922_v5, %v3035_v55  ;;  %v3148_v24 = vsel %vm3111_vm2, %v5988_v14, -inf }
 0x4ed   :  { %v3157_v46 = vsel %vm3111_vm2, %v5991_v1, -inf }
 0x4ee   :  { %3158 = vmax.xlane.f32.xlu1 %v3157_v46  ;;  %v3151_v15 = vsel %vm3111_vm2, %v5996_v2, -inf }
 0x4f0   :  { %3149 = vmax.xlane.f32.xlu0 %v3148_v24 }
 0x4f2   :  { %3152 = vmax.xlane.f32.xlu1 %v3151_v15 }
 0x4f8   :  { %v4035_v56 = vpop.f32.mrb[176].mxu1 }
 0x4f9   :  { %v6005_v54 = vadd.f32 %v4035_v56, %v5922_v5  ;;  %v3048_v40 = vpop.f32.mrb[177].mxu1 }
 0x4fa   :  { %v4036_v16 = vpop.f32.mrb[178].mxu1  ;;  %v6008_v44 = vadd.f32 %v5922_v5, %v3048_v40 }
 0x4fb   :  { %v6011_v3 = vadd.f32 %v4036_v16, %v5922_v5  ;;  %v3051_v57 = vpop.f32.mrb[179].mxu1  ;;  %v3166_v47 = vsel %vm3111_vm2, %v6005_v54, -inf }
 0x4fc   :  { %3167 = vmax.xlane.f32.xlu0 %v3166_v47  ;;  %v6016_v17 = vadd.f32 %v5922_v5, %v3051_v57  ;;  %v3160_v4 = vsel %vm3111_vm2, %v6008_v44, -inf }
 0x4fd   :  { %v3169_v23 = vsel %vm3111_vm2, %v6011_v3, -inf }
 0x4fe   :  { %3170 = vmax.xlane.f32.xlu1 %v3169_v23  ;;  %v3163_v58 = vsel %vm3111_vm2, %v6016_v17, -inf }
 0x500   :  { %3161 = vmax.xlane.f32.xlu0 %v3160_v4 }
 0x502   :  { %3164 = vmax.xlane.f32.xlu1 %v3163_v58 }
 0x508   :  { %v4039_v18 = vpop.f32.mrb[180].mxu1 }
 0x509   :  { %v6025_v35 = vadd.f32 %v4039_v18, %v5922_v5  ;;  %v3064_v48 = vpop.f32.mrb[181].mxu1 }
 0x50a   :  { %v4040_v41 = vpop.f32.mrb[182].mxu1  ;;  %v6028_v8 = vadd.f32 %v5922_v5, %v3064_v48 }
 0x50b   :  { %v6031_v21 = vadd.f32 %v4040_v41, %v5922_v5  ;;  %v3067_v59 = vpop.f32.mrb[183].mxu1  ;;  %v3178_v42 = vsel %vm3111_vm2, %v6025_v35, -inf }
 0x50c   :  { %3179 = vmax.xlane.f32.xlu0 %v3178_v42  ;;  %v6036_v50 = vadd.f32 %v5922_v5, %v3067_v59  ;;  %v3172_v60 = vsel %vm3111_vm2, %v6028_v8, -inf }
 0x50d   :  { %v3181_v7 = vsel %vm3111_vm2, %v6031_v21, -inf }
 0x50e   :  { %3182 = vmax.xlane.f32.xlu1 %v3181_v7  ;;  %v3175_v26 = vsel %vm3111_vm2, %v6036_v50, -inf }
 0x510   :  { %3173 = vmax.xlane.f32.xlu0 %v3172_v60 }
 0x512   :  { %3176 = vmax.xlane.f32.xlu1 %v3175_v26 }
 0x518   :  { %v4043_v27 = vpop.f32.mrb[184].mxu1 }
 0x519   :  { %v6045_v61 = vadd.f32 %v4043_v27, %v5922_v5  ;;  %v3080_v43 = vpop.f32.mrb[185].mxu1 }
 0x51a   :  { %v4044_v62 = vpop.f32.mrb[186].mxu1  ;;  %v6048_v34 = vadd.f32 %v5922_v5, %v3080_v43 }
 0x51b   :  { %v6051_v31 = vadd.f32 %v4044_v62, %v5922_v5  ;;  %v3083_v28 = vpop.f32.mrb[187].mxu1  ;;  %v3190_v37 = vsel %vm3111_vm2, %v6045_v61, -inf }
 0x51c   :  { %3191 = vmax.xlane.f32.xlu0 %v3190_v37  ;;  %v6056_v32 = vadd.f32 %v5922_v5, %v3083_v28  ;;  %v3184_v63 = vsel %vm3111_vm2, %v6048_v34, -inf }
 0x51d   :  { %v3193_v38 = vsel %vm3111_vm2, %v6051_v31, -inf }
 0x51e   :  { %3194 = vmax.xlane.f32.xlu1 %v3193_v38  ;;  %v3187_v19 = vsel %vm3111_vm2, %v6056_v32, -inf }
 0x520   :  { %3185 = vmax.xlane.f32.xlu0 %v3184_v63 }
 0x522   :  { %3188 = vmax.xlane.f32.xlu1 %v3187_v19 }
 0x528   :  { %v4047_v12 = vpop.f32.mrb[188].mxu1 }
 0x529   :  { %v3096_v29 = vpop.f32.mrb[189].mxu1  ;;  %v6068_v33 = vadd.f32 %v4047_v12, %v5922_v5 }
 0x52a   :  { %v6065_v0 = vadd.f32 %v5922_v5, %v3096_v29  ;;  %v4048_v45 = vpop.f32.mrb[190].mxu1 }
 0x52b   :  { %v3099_v22 = vpop.f32.mrb[191].mxu1  ;;  %v6076_v46 = vadd.f32 %v4048_v45, %v5922_v5  ;;  %v3202_v15 = vsel %vm3111_vm2, %v6068_v33, -inf }
 0x52c   :  { %v6071_v55 = vadd.f32 %v5922_v5, %v3099_v22  ;;  %v3196_v30 = vsel %vm3111_vm2, %v6065_v0, -inf }
 0x52d   :  { %3197 = vmax.xlane.f32.xlu0 %v3196_v30  ;;  %v3205_v56 = vsel %vm3111_vm2, %v6076_v46, -inf }
 0x52e   :  { %v3199_v24 = vsel %vm3111_vm2, %v6071_v55, -inf }
 0x52f   :  { %3200 = vmax.xlane.f32.xlu1 %v3199_v24 }
 0x531   :  { %3203 = vmax.xlane.f32.xlu0 %v3202_v15 }
 0x533   :  { %3206 = vmax.xlane.f32.xlu1 %v3205_v56 }
 0x549   :  { %v3120_v40 = vpop.xlane.xlu1 %3119 }
 0x54a   :  { %v6085_v16 = vsub.f32 %v5925_v25, %v3120_v40  ;;  %v3114_v57 = vpop.xlane.xlu0 %3113 }
 0x54b   :  { %v6088_v5 = vsub.f32 %v5928_v6, %v3114_v57 }
 0x54c   :  { %v3244_v47 = vmul.f32 1.442695, %v6085_v16 }
 0x54d   :  { %v3240_v23 = vmul.f32 1.442695, %v6088_v5  ;;  %v3123_v4 = vpop.xlane.xlu1 %3122 }
 0x54e   :  { %4641 = vpow2.f32 %v3244_v47  ;;  %v6093_v58 = vsub.f32 %v5931_v39, %v3123_v4  ;;  %v3117_v18 = vpop.xlane.xlu0 %3116 }
 0x54f   :  { %v6096_v48 = vsub.f32 %v5936_v36, %v3117_v18  ;;  %4643 = vpow2.f32 %v3240_v23 }
 0x550   :  { %v3246_v25 = vmul.f32 1.442695, %v6093_v58 }
 0x551   :  { %v3242_v41 = vmul.f32 1.442695, %v6096_v48 }
 0x552   :  { %4645 = vpow2.f32 %v3246_v25 }
 0x553   :  { %4647 = vpow2.f32 %v3242_v41 }
 0x558   :  { %v4642_v6 = vpop.eup %4641 }
 0x559   :  { %v3132_v59 = vpop.xlane.xlu0 %3131  ;;  %v3310_v42 = vsel %vm3111_vm2, %v4642_v6, 0.0  ;;  %v4644_v7 = vpop.eup %4643 }
 0x55a   :  { %v6102_v60 = vsub.f32 %v5945_v20, %v3132_v59  ;;  %3311 = vadd.xlane.f32.xlu0 %v3310_v42  ;;  %v3304_v28 = vsel %vm3111_vm2, %v4644_v7, 0.0 }
 0x55b   :  { %v3135_v39 = vpop.xlane.xlu1 %3134 }
 0x55c   :  { %v4646_v26 = vpop.eup %4645  ;;  %v3252_v36 = vmul.f32 1.442695, %v6102_v60  ;;  %v6106_v27 = vsub.f32 %v5951_v9, %v3135_v39 }
 0x55d   :  { %v3126_v43 = vpop.xlane.xlu0 %3125  ;;  %v3313_v62 = vsel %vm3111_vm2, %v4646_v26, 0.0  ;;  %v4648_v37 = vpop.eup %4647 }
 0x55e   :  { %4649 = vpow2.f32 %v3252_v36  ;;  %v3254_v38 = vmul.f32 1.442695, %v6106_v27  ;;  %v6112_v20 = vsub.f32 %v5948_v51, %v3126_v43  ;;  %3314 = vadd.xlane.f32.xlu1 %v3313_v62  ;;  %3305 = vadd.xlane.f32.xlu0 %v3304_v28  ;;  %v3307_v12 = vsel %vm3111_vm2, %v4648_v37, 0.0 }
 0x55f   :  { %v3129_v63 = vpop.xlane.xlu1 %3128 }
 0x560   :  { %4651 = vpow2.f32 %v3254_v38  ;;  %v3248_v19 = vmul.f32 1.442695, %v6112_v20  ;;  %v6116_v9 = vsub.f32 %v5956_v10, %v3129_v63 }
 0x562   :  { %4653 = vpow2.f32 %v3248_v19  ;;  %v3250_v29 = vmul.f32 1.442695, %v6116_v9  ;;  %3308 = vadd.xlane.f32.xlu1 %v3307_v12 }
 0x564   :  { %4655 = vpow2.f32 %v3250_v29 }
 0x568   :  { %v4650_v45 = vpop.eup %4649 }
 0x569   :  { %v3144_v22 = vpop.xlane.xlu0 %3143  ;;  %v3322_v51 = vsel %vm3111_vm2, %v4650_v45, 0.0 }
 0x56a   :  { %v4652_v30 = vpop.eup %4651  ;;  %v6122_v24 = vsub.f32 %v5965_v52, %v3144_v22  ;;  %3323 = vadd.xlane.f32.xlu0 %v3322_v51 }
 0x56b   :  { %v3147_v15 = vpop.xlane.xlu1 %3146  ;;  %v3325_v10 = vsel %vm3111_vm2, %v4652_v30, 0.0 }
 0x56c   :  { %v4654_v56 = vpop.eup %4653  ;;  %v3260_v40 = vmul.f32 1.442695, %v6122_v24  ;;  %v6127_v57 = vsub.f32 %v5971_v11, %v3147_v15  ;;  %3326 = vadd.xlane.f32.xlu1 %v3325_v10 }
 0x56d   :  { %v3138_v47 = vpop.xlane.xlu0 %3137  ;;  %v3316_v23 = vsel %vm3111_vm2, %v4654_v56, 0.0 }
 0x56e   :  { %v4656_v4 = vpop.eup %4655  ;;  %4657 = vpow2.f32 %v3260_v40  ;;  %v3262_v18 = vmul.f32 1.442695, %v6127_v57  ;;  %v6132_v52 = vsub.f32 %v5968_v53, %v3138_v47  ;;  %3317 = vadd.xlane.f32.xlu0 %v3316_v23 }
 0x56f   :  { %v3141_v25 = vpop.xlane.xlu1 %3140  ;;  %v3319_v41 = vsel %vm3111_vm2, %v4656_v4, 0.0 }
 0x570   :  { %4659 = vpow2.f32 %v3262_v18  ;;  %v3256_v6 = vmul.f32 1.442695, %v6132_v52  ;;  %v6137_v11 = vsub.f32 %v5976_v49, %v3141_v25  ;;  %3320 = vadd.xlane.f32.xlu1 %v3319_v41 }
 0x572   :  { %4661 = vpow2.f32 %v3256_v6  ;;  %v3258_v59 = vmul.f32 1.442695, %v6137_v11 }
 0x574   :  { %4663 = vpow2.f32 %v3258_v59 }
 0x578   :  { %v4658_v42 = vpop.eup %4657 }
 0x579   :  { %v3156_v7 = vpop.xlane.xlu0 %3155  ;;  %v3334_v53 = vsel %vm3111_vm2, %v4658_v42, 0.0 }
 0x57a   :  { %v4660_v39 = vpop.eup %4659  ;;  %v6142_v26 = vsub.f32 %v5985_v13, %v3156_v7  ;;  %3335 = vadd.xlane.f32.xlu0 %v3334_v53 }
 0x57b   :  { %v3159_v36 = vpop.xlane.xlu1 %3158  ;;  %v3337_v43 = vsel %vm3111_vm2, %v4660_v39, 0.0 }
 0x57c   :  { %v4662_v62 = vpop.eup %4661  ;;  %v3268_v49 = vmul.f32 1.442695, %v6142_v26  ;;  %v6147_v28 = vsub.f32 %v5991_v1, %v3159_v36  ;;  %3338 = vadd.xlane.f32.xlu1 %v3337_v43 }
 0x57d   :  { %v3150_v37 = vpop.xlane.xlu0 %3149  ;;  %v3328_v38 = vsel %vm3111_vm2, %v4662_v62, 0.0 }
 0x57e   :  { %v4664_v63 = vpop.eup %4663  ;;  %4665 = vpow2.f32 %v3268_v49  ;;  %v3270_v19 = vmul.f32 1.442695, %v6147_v28  ;;  %v6152_v13 = vsub.f32 %v5988_v14, %v3150_v37  ;;  %3329 = vadd.xlane.f32.xlu0 %v3328_v38 }
 0x57f   :  { %v3153_v12 = vpop.xlane.xlu1 %3152  ;;  %v3331_v29 = vsel %vm3111_vm2, %v4664_v63, 0.0 }
 0x580   :  { %4667 = vpow2.f32 %v3270_v19  ;;  %v3264_v45 = vmul.f32 1.442695, %v6152_v13  ;;  %v6157_v1 = vsub.f32 %v5996_v2, %v3153_v12  ;;  %3332 = vadd.xlane.f32.xlu1 %v3331_v29 }
 0x582   :  { %4669 = vpow2.f32 %v3264_v45  ;;  %v3266_v22 = vmul.f32 1.442695, %v6157_v1 }
 0x584   :  { %4671 = vpow2.f32 %v3266_v22 }
 0x588   :  { %v4666_v51 = vpop.eup %4665 }
 0x589   :  { %v3168_v30 = vpop.xlane.xlu0 %3167  ;;  %v3346_v14 = vsel %vm3111_vm2, %v4666_v51, 0.0 }
 0x58a   :  { %v4668_v15 = vpop.eup %4667  ;;  %v6162_v10 = vsub.f32 %v6005_v54, %v3168_v30  ;;  %3347 = vadd.xlane.f32.xlu0 %v3346_v14 }
 0x58b   :  { %v3171_v56 = vpop.xlane.xlu1 %3170  ;;  %v3349_v40 = vsel %vm3111_vm2, %v4668_v15, 0.0 }
 0x58c   :  { %v4670_v47 = vpop.eup %4669  ;;  %v3276_v2 = vmul.f32 1.442695, %v6162_v10  ;;  %v6167_v23 = vsub.f32 %v6011_v3, %v3171_v56  ;;  %3350 = vadd.xlane.f32.xlu1 %v3349_v40 }
 0x58d   :  { %v3162_v4 = vpop.xlane.xlu0 %3161  ;;  %v3340_v18 = vsel %vm3111_vm2, %v4670_v47, 0.0 }
 0x58e   :  { %v4672_v25 = vpop.eup %4671  ;;  %4673 = vpow2.f32 %v3276_v2  ;;  %v3278_v41 = vmul.f32 1.442695, %v6167_v23  ;;  %v6172_v54 = vsub.f32 %v6008_v44, %v3162_v4  ;;  %3341 = vadd.xlane.f32.xlu0 %v3340_v18 }
 0x58f   :  { %v3165_v6 = vpop.xlane.xlu1 %3164  ;;  %v3343_v59 = vsel %vm3111_vm2, %v4672_v25, 0.0 }
 0x590   :  { %4675 = vpow2.f32 %v3278_v41  ;;  %v3272_v42 = vmul.f32 1.442695, %v6172_v54  ;;  %v6177_v3 = vsub.f32 %v6016_v17, %v3165_v6  ;;  %3344 = vadd.xlane.f32.xlu1 %v3343_v59 }
 0x592   :  { %4677 = vpow2.f32 %v3272_v42  ;;  %v3274_v7 = vmul.f32 1.442695, %v6177_v3 }
 0x594   :  { %4679 = vpow2.f32 %v3274_v7 }
 0x598   :  { %v4674_v53 = vpop.eup %4673 }
 0x599   :  { %v3180_v39 = vpop.xlane.xlu0 %3179  ;;  %v3358_v44 = vsel %vm3111_vm2, %v4674_v53, 0.0 }
 0x59a   :  { %v4676_v36 = vpop.eup %4675  ;;  %v6182_v43 = vsub.f32 %v6025_v35, %v3180_v39  ;;  %3359 = vadd.xlane.f32.xlu0 %v3358_v44 }
 0x59b   :  { %v3183_v62 = vpop.xlane.xlu1 %3182  ;;  %v3361_v49 = vsel %vm3111_vm2, %v4676_v36, 0.0 }
 0x59c   :  { %v4678_v37 = vpop.eup %4677  ;;  %v3284_v17 = vmul.f32 1.442695, %v6182_v43  ;;  %v6187_v38 = vsub.f32 %v6031_v21, %v3183_v62  ;;  %3362 = vadd.xlane.f32.xlu1 %v3361_v49 }
 0x59d   :  { %v3174_v63 = vpop.xlane.xlu0 %3173  ;;  %v3352_v19 = vsel %vm3111_vm2, %v4678_v37, 0.0 }
 0x59e   :  { %v4680_v12 = vpop.eup %4679  ;;  %4681 = vpow2.f32 %v3284_v17  ;;  %v3286_v29 = vmul.f32 1.442695, %v6187_v38  ;;  %v6192_v35 = vsub.f32 %v6028_v8, %v3174_v63  ;;  %3353 = vadd.xlane.f32.xlu0 %v3352_v19 }
 0x59f   :  { %v3177_v45 = vpop.xlane.xlu1 %3176  ;;  %v3355_v22 = vsel %vm3111_vm2, %v4680_v12, 0.0 }
 0x5a0   :  { %4683 = vpow2.f32 %v3286_v29  ;;  %v3280_v51 = vmul.f32 1.442695, %v6192_v35  ;;  %v6197_v21 = vsub.f32 %v6036_v50, %v3177_v45  ;;  %3356 = vadd.xlane.f32.xlu1 %v3355_v22 }
 0x5a2   :  { %4685 = vpow2.f32 %v3280_v51  ;;  %v3282_v30 = vmul.f32 1.442695, %v6197_v21 }
 0x5a4   :  { %4687 = vpow2.f32 %v3282_v30 }
 0x5a8   :  { %v4682_v14 = vpop.eup %4681 }
 0x5a9   :  { %v3192_v15 = vpop.xlane.xlu0 %3191  ;;  %v3370_v8 = vsel %vm3111_vm2, %v4682_v14, 0.0 }
 0x5aa   :  { %v4684_v56 = vpop.eup %4683  ;;  %v6202_v40 = vsub.f32 %v6045_v61, %v3192_v15  ;;  %3371 = vadd.xlane.f32.xlu0 %v3370_v8 }
 0x5ab   :  { %v3195_v47 = vpop.xlane.xlu1 %3194  ;;  %v3373_v2 = vsel %vm3111_vm2, %v4684_v56, 0.0 }
 0x5ac   :  { %v4686_v4 = vpop.eup %4685  ;;  %v3292_v50 = vmul.f32 1.442695, %v6202_v40  ;;  %v6207_v18 = vsub.f32 %v6051_v31, %v3195_v47  ;;  %3374 = vadd.xlane.f32.xlu1 %v3373_v2 }
 0x5ad   :  { %v3186_v25 = vpop.xlane.xlu0 %3185  ;;  %v3364_v41 = vsel %vm3111_vm2, %v4686_v4, 0.0 }
 0x5ae   :  { %v4688_v6 = vpop.eup %4687  ;;  %4689 = vpow2.f32 %v3292_v50  ;;  %v3294_v59 = vmul.f32 1.442695, %v6207_v18  ;;  %v6212_v61 = vsub.f32 %v6048_v34, %v3186_v25  ;;  %3365 = vadd.xlane.f32.xlu0 %v3364_v41 }
 0x5af   :  { %v3189_v42 = vpop.xlane.xlu1 %3188  ;;  %v3367_v7 = vsel %vm3111_vm2, %v4688_v6, 0.0 }
 0x5b0   :  { %4691 = vpow2.f32 %v3294_v59  ;;  %v3288_v53 = vmul.f32 1.442695, %v6212_v61  ;;  %v6217_v31 = vsub.f32 %v6056_v32, %v3189_v42  ;;  %3368 = vadd.xlane.f32.xlu1 %v3367_v7 }
 0x5b2   :  { %4693 = vpow2.f32 %v3288_v53  ;;  %v3290_v39 = vmul.f32 1.442695, %v6217_v31 }
 0x5b4   :  { %4695 = vpow2.f32 %v3290_v39 }
 0x5b8   :  { %v4690_v44 = vpop.eup %4689 }
 0x5b9   :  { %v3382_v36 = vsel %vm3111_vm2, %v4690_v44, 0.0 }
 0x5ba   :  { %v4692_v34 = vpop.eup %4691  ;;  %3383 = vadd.xlane.f32.xlu0 %v3382_v36  ;;  %v3198_v62 = vpop.xlane.xlu0 %3197 }
 0x5bb   :  { %v6222_v49 = vsub.f32 %v6065_v0, %v3198_v62  ;;  %v3385_v37 = vsel %vm3111_vm2, %v4692_v34, 0.0 }
 0x5bc   :  { %v4694_v17 = vpop.eup %4693  ;;  %v3201_v63 = vpop.xlane.xlu1 %3200  ;;  %3386 = vadd.xlane.f32.xlu1 %v3385_v37 }
 0x5bd   :  { %v3296_v32 = vmul.f32 1.442695, %v6222_v49  ;;  %v6227_v19 = vsub.f32 %v6071_v55, %v3201_v63  ;;  %v3376_v12 = vsel %vm3111_vm2, %v4694_v17, 0.0 }
 0x5be   :  { %v4696_v29 = vpop.eup %4695  ;;  %3377 = vadd.xlane.f32.xlu0 %v3376_v12  ;;  %v3204_v45 = vpop.xlane.xlu0 %3203 }
 0x5bf   :  { %4697 = vpow2.f32 %v3296_v32  ;;  %v3298_v22 = vmul.f32 1.442695, %v6227_v19  ;;  %v6232_v0 = vsub.f32 %v6068_v33, %v3204_v45  ;;  %v3379_v51 = vsel %vm3111_vm2, %v4696_v29, 0.0 }
 0x5c0   :  { %v3207_v30 = vpop.xlane.xlu1 %3206  ;;  %3380 = vadd.xlane.f32.xlu1 %v3379_v51 }
 0x5c1   :  { %4699 = vpow2.f32 %v3298_v22  ;;  %v3300_v14 = vmul.f32 1.442695, %v6232_v0  ;;  %v6237_v55 = vsub.f32 %v6076_v46, %v3207_v30 }
 0x5c3   :  { %4701 = vpow2.f32 %v3300_v14  ;;  %v3302_v15 = vmul.f32 1.442695, %v6237_v55 }
 0x5c5   :  { %4703 = vpow2.f32 %v3302_v15 }
 0x5c9   :  { %v4698_v8 = vpop.eup %4697 }
 0x5ca   :  { %v3388_v56 = vsel %vm3111_vm2, %v4698_v8, 0.0 }
 0x5cb   :  { %v4700_v47 = vpop.eup %4699  ;;  %3389 = vadd.xlane.f32.xlu0 %v3388_v56 }
 0x5cc   :  { %v3391_v33 = vsel %vm3111_vm2, %v4700_v47, 0.0 }
 0x5cd   :  { %v4702_v2 = vpop.eup %4701  ;;  %3392 = vadd.xlane.f32.xlu1 %v3391_v33 }
 0x5ce   :  { %v3394_v4 = vsel %vm3111_vm2, %v4702_v2, 0.0 }
 0x5cf   :  { %v4704_v50 = vpop.eup %4703  ;;  %3395 = vadd.xlane.f32.xlu0 %v3394_v4 }
 0x5d0   :  { %v3397_v46 = vsel %vm3111_vm2, %v4704_v50, 0.0 }
 0x5d1   :  { %3398 = vadd.xlane.f32.xlu1 %v3397_v46 }
 0x5e7   :  { %v3312_v25 = vpop.xlane.xlu0 %3311 }
 0x5e8   :  { %4705 = vlog2.f32 %v3312_v25 }
 0x5eb   :  { %v3315_v41 = vpop.xlane.xlu1 %3314  ;;  %v3306_v6 = vpop.xlane.xlu0 %3305 }
 0x5ec   :  { %4707 = vlog2.f32 %v3315_v41 }
 0x5ed   :  { %4709 = vlog2.f32 %v3306_v6 }
 0x5ef   :  { %v3309_v59 = vpop.xlane.xlu1 %3308 }
 0x5f0   :  { %4711 = vlog2.f32 %v3309_v59 }
 0x5f2   :  { %v4706_v42 = vpop.eup %4705 }
 0x5f3   :  { %v3405_v7 = vmul.f32 0.6931472, %v4706_v42 }
 0x5f5   :  { %v3466_v53 = vsub.f32 %v6085_v16, %v3405_v7 }
 0x5f6   :  { %v4708_v39 = vpop.eup %4707 }
 0x5f7   :  { %v4710_v44 = vpop.eup %4709  ;;  %3498 = vst.msk [vmem:[%s6413_s9 + $0x10] sm:$0xff] %vm3111_vm2, %v3466_v53  ;;  %v3407_v36 = vmul.f32 0.6931472, %v4708_v39  ;;  %v3324_v34 = vpop.xlane.xlu0 %3323 }
 0x5f8   :  { %v3401_v62 = vmul.f32 0.6931472, %v4710_v44  ;;  %4713 = vlog2.f32 %v3324_v34 }
 0x5f9   :  { %v3467_v37 = vsub.f32 %v6093_v58, %v3407_v36  ;;  %v3327_v17 = vpop.xlane.xlu1 %3326 }
 0x5fa   :  { %v4712_v63 = vpop.eup %4711  ;;  %v3464_v32 = vsub.f32 %v6088_v5, %v3401_v62  ;;  %4715 = vlog2.f32 %v3327_v17 }
 0x5fb   :  { %3499 = vst.msk [vmem:[%s6413_s9 + $0x18] sm:$0xff] %vm3111_vm2, %v3467_v37  ;;  %v3403_v16 = vmul.f32 0.6931472, %v4712_v63  ;;  %v3318_v12 = vpop.xlane.xlu0 %3317 }
 0x5fc   :  { %3496 = vst.msk [vmem:[%s6413_s9] sm:$0xff] %vm3111_vm2, %v3464_v32  ;;  %4717 = vlog2.f32 %v3318_v12 }
 0x5fd   :  { %v3465_v58 = vsub.f32 %v6096_v48, %v3403_v16  ;;  %v3321_v29 = vpop.xlane.xlu1 %3320 }
 0x5fe   :  { %4719 = vlog2.f32 %v3321_v29 }
 0x5ff   :  { %3497 = vst.msk [vmem:[%s6413_s9 + $0x8] sm:$0xff] %vm3111_vm2, %v3465_v58 }
 0x602   :  { %v4714_v5 = vpop.eup %4713 }
 0x603   :  { %v3413_v45 = vmul.f32 0.6931472, %v4714_v5 }
 0x604   :  { %v4716_v22 = vpop.eup %4715 }
 0x605   :  { %v3470_v51 = vsub.f32 %v6102_v60, %v3413_v45  ;;  %v3415_v30 = vmul.f32 0.6931472, %v4716_v22 }
 0x606   :  { %v4718_v14 = vpop.eup %4717 }
 0x607   :  { %3502 = vst.msk [vmem:[%s6413_s9 + $0x30] sm:$0xff] %vm3111_vm2, %v3470_v51  ;;  %v3471_v48 = vsub.f32 %v6106_v27, %v3415_v30  ;;  %v3409_v15 = vmul.f32 0.6931472, %v4718_v14  ;;  %v3336_v8 = vpop.xlane.xlu0 %3335 }
 0x608   :  { %v4720_v56 = vpop.eup %4719  ;;  %4721 = vlog2.f32 %v3336_v8 }
 0x609   :  { %3503 = vst.msk [vmem:[%s6413_s9 + $0x38] sm:$0xff] %vm3111_vm2, %v3471_v48  ;;  %v3468_v60 = vsub.f32 %v6112_v20, %v3409_v15  ;;  %v3411_v47 = vmul.f32 0.6931472, %v4720_v56  ;;  %v3339_v33 = vpop.xlane.xlu1 %3338 }
 0x60a   :  { %4723 = vlog2.f32 %v3339_v33 }
 0x60b   :  { %3500 = vst.msk [vmem:[%s6413_s9 + $0x20] sm:$0xff] %vm3111_vm2, %v3468_v60  ;;  %v3469_v27 = vsub.f32 %v6116_v9, %v3411_v47  ;;  %v3330_v2 = vpop.xlane.xlu0 %3329 }
 0x60c   :  { %4725 = vlog2.f32 %v3330_v2 }
 0x60d   :  { %3501 = vst.msk [vmem:[%s6413_s9 + $0x28] sm:$0xff] %vm3111_vm2, %v3469_v27  ;;  %v3333_v4 = vpop.xlane.xlu1 %3332 }
 0x60e   :  { %4727 = vlog2.f32 %v3333_v4 }
 0x612   :  { %v4722_v20 = vpop.eup %4721 }
 0x613   :  { %v3421_v50 = vmul.f32 0.6931472, %v4722_v20 }
 0x614   :  { %v4724_v46 = vpop.eup %4723 }
 0x615   :  { %v3474_v25 = vsub.f32 %v6122_v24, %v3421_v50  ;;  %v3423_v41 = vmul.f32 0.6931472, %v4724_v46 }
 0x616   :  { %v4726_v6 = vpop.eup %4725 }
 0x617   :  { %3506 = vst.msk [vmem:[%s6413_s9 + $0x50] sm:$0xff] %vm3111_vm2, %v3474_v25  ;;  %v3475_v9 = vsub.f32 %v6127_v57, %v3423_v41  ;;  %v3417_v59 = vmul.f32 0.6931472, %v4726_v6  ;;  %v3348_v42 = vpop.xlane.xlu0 %3347 }
 0x618   :  { %v4728_v7 = vpop.eup %4727  ;;  %4729 = vlog2.f32 %v3348_v42 }
 0x619   :  { %3507 = vst.msk [vmem:[%s6413_s9 + $0x58] sm:$0xff] %vm3111_vm2, %v3475_v9  ;;  %v3472_v24 = vsub.f32 %v6132_v52, %v3417_v59  ;;  %v3419_v53 = vmul.f32 0.6931472, %v4728_v7  ;;  %v3351_v39 = vpop.xlane.xlu1 %3350 }
 0x61a   :  { %4731 = vlog2.f32 %v3351_v39 }
 0x61b   :  { %3504 = vst.msk [vmem:[%s6413_s9 + $0x40] sm:$0xff] %vm3111_vm2, %v3472_v24  ;;  %v3473_v57 = vsub.f32 %v6137_v11, %v3419_v53  ;;  %v3342_v44 = vpop.xlane.xlu0 %3341 }
 0x61c   :  { %4733 = vlog2.f32 %v3342_v44 }
 0x61d   :  { %3505 = vst.msk [vmem:[%s6413_s9 + $0x48] sm:$0xff] %vm3111_vm2, %v3473_v57  ;;  %v3345_v36 = vpop.xlane.xlu1 %3344 }
 0x61e   :  { %4735 = vlog2.f32 %v3345_v36 }
 0x622   :  { %v4730_v52 = vpop.eup %4729 }
 0x623   :  { %v3429_v34 = vmul.f32 0.6931472, %v4730_v52 }
 0x624   :  { %v4732_v62 = vpop.eup %4731 }
 0x625   :  { %v3478_v37 = vsub.f32 %v6142_v26, %v3429_v34  ;;  %v3431_v17 = vmul.f32 0.6931472, %v4732_v62 }
 0x626   :  { %v4734_v63 = vpop.eup %4733 }
 0x627   :  { %3510 = vst.msk [vmem:[%s6413_s9 + $0x70] sm:$0xff] %vm3111_vm2, %v3478_v37  ;;  %v3479_v11 = vsub.f32 %v6147_v28, %v3431_v17  ;;  %v3425_v32 = vmul.f32 0.6931472, %v4734_v63  ;;  %v3360_v16 = vpop.xlane.xlu0 %3359 }
 0x628   :  { %v4736_v12 = vpop.eup %4735  ;;  %4737 = vlog2.f32 %v3360_v16 }
 0x629   :  { %3511 = vst.msk [vmem:[%s6413_s9 + $0x78] sm:$0xff] %vm3111_vm2, %v3479_v11  ;;  %v3476_v26 = vsub.f32 %v6152_v13, %v3425_v32  ;;  %v3427_v58 = vmul.f32 0.6931472, %v4736_v12  ;;  %v3363_v29 = vpop.xlane.xlu1 %3362 }
 0x62a   :  { %4739 = vlog2.f32 %v3363_v29 }
 0x62b   :  { %3508 = vst.msk [vmem:[%s6413_s9 + $0x60] sm:$0xff] %vm3111_vm2, %v3476_v26  ;;  %v3477_v28 = vsub.f32 %v6157_v1, %v3427_v58  ;;  %v3354_v5 = vpop.xlane.xlu0 %3353 }
 0x62c   :  { %4741 = vlog2.f32 %v3354_v5 }
 0x62d   :  { %3509 = vst.msk [vmem:[%s6413_s9 + $0x68] sm:$0xff] %vm3111_vm2, %v3477_v28  ;;  %v3357_v45 = vpop.xlane.xlu1 %3356 }
 0x62e   :  { %4743 = vlog2.f32 %v3357_v45 }
 0x632   :  { %v4738_v13 = vpop.eup %4737 }
 0x633   :  { %v3437_v22 = vmul.f32 0.6931472, %v4738_v13 }
 0x634   :  { %v4740_v51 = vpop.eup %4739 }
 0x635   :  { %v3482_v30 = vsub.f32 %v6162_v10, %v3437_v22  ;;  %v3439_v14 = vmul.f32 0.6931472, %v4740_v51 }
 0x636   :  { %v4742_v48 = vpop.eup %4741 }
 0x637   :  { %3514 = vst.msk [vmem:[%s6413_s9 + $0x90] sm:$0xff] %vm3111_vm2, %v3482_v30  ;;  %v3483_v1 = vsub.f32 %v6167_v23, %v3439_v14  ;;  %v3433_v15 = vmul.f32 0.6931472, %v4742_v48  ;;  %v3372_v8 = vpop.xlane.xlu0 %3371 }
 0x638   :  { %v4744_v56 = vpop.eup %4743  ;;  %4745 = vlog2.f32 %v3372_v8 }
 0x639   :  { %3515 = vst.msk [vmem:[%s6413_s9 + $0x98] sm:$0xff] %vm3111_vm2, %v3483_v1  ;;  %v3480_v10 = vsub.f32 %v6172_v54, %v3433_v15  ;;  %v3435_v60 = vmul.f32 0.6931472, %v4744_v56  ;;  %v3375_v47 = vpop.xlane.xlu1 %3374 }
 0x63a   :  { %4747 = vlog2.f32 %v3375_v47 }
 0x63b   :  { %3512 = vst.msk [vmem:[%s6413_s9 + $0x80] sm:$0xff] %vm3111_vm2, %v3480_v10  ;;  %v3481_v23 = vsub.f32 %v6177_v3, %v3435_v60  ;;  %v3366_v33 = vpop.xlane.xlu0 %3365 }
 0x63c   :  { %4749 = vlog2.f32 %v3366_v33 }
 0x63d   :  { %3513 = vst.msk [vmem:[%s6413_s9 + $0x88] sm:$0xff] %vm3111_vm2, %v3481_v23  ;;  %v3369_v27 = vpop.xlane.xlu1 %3368 }
 0x63e   :  { %4751 = vlog2.f32 %v3369_v27 }
 0x642   :  { %v4746_v54 = vpop.eup %4745 }
 0x643   :  { %v3445_v2 = vmul.f32 0.6931472, %v4746_v54 }
 0x644   :  { %v4748_v4 = vpop.eup %4747 }
 0x645   :  { %v3486_v20 = vsub.f32 %v6182_v43, %v3445_v2  ;;  %v3447_v50 = vmul.f32 0.6931472, %v4748_v4 }
 0x646   :  { %v4750_v46 = vpop.eup %4749 }
 0x647   :  { %3518 = vst.msk [vmem:[%s6413_s9 + $0xb0] sm:$0xff] %vm3111_vm2, %v3486_v20  ;;  %v3487_v3 = vsub.f32 %v6187_v38, %v3447_v50  ;;  %v3441_v25 = vmul.f32 0.6931472, %v4750_v46  ;;  %v3384_v41 = vpop.xlane.xlu0 %3383 }
 0x648   :  { %v4752_v6 = vpop.eup %4751  ;;  %4753 = vlog2.f32 %v3384_v41 }
 0x649   :  { %3519 = vst.msk [vmem:[%s6413_s9 + $0xb8] sm:$0xff] %vm3111_vm2, %v3487_v3  ;;  %v3484_v43 = vsub.f32 %v6192_v35, %v3441_v25  ;;  %v3443_v9 = vmul.f32 0.6931472, %v4752_v6  ;;  %v3387_v59 = vpop.xlane.xlu1 %3386 }
 0x64a   :  { %4755 = vlog2.f32 %v3387_v59 }
 0x64b   :  { %3516 = vst.msk [vmem:[%s6413_s9 + $0xa0] sm:$0xff] %vm3111_vm2, %v3484_v43  ;;  %v3485_v38 = vsub.f32 %v6197_v21, %v3443_v9  ;;  %v3378_v42 = vpop.xlane.xlu0 %3377 }
 0x64c   :  { %4757 = vlog2.f32 %v3378_v42 }
 0x64d   :  { %3517 = vst.msk [vmem:[%s6413_s9 + $0xa8] sm:$0xff] %vm3111_vm2, %v3485_v38  ;;  %v3381_v7 = vpop.xlane.xlu1 %3380 }
 0x64e   :  { %4759 = vlog2.f32 %v3381_v7 }
 0x652   :  { %v4754_v35 = vpop.eup %4753 }
 0x653   :  { %v3453_v24 = vmul.f32 0.6931472, %v4754_v35 }
 0x654   :  { %v4756_v53 = vpop.eup %4755 }
 0x655   :  { %v3490_v39 = vsub.f32 %v6202_v40, %v3453_v24  ;;  %v3455_v57 = vmul.f32 0.6931472, %v4756_v53 }
 0x656   :  { %v4758_v44 = vpop.eup %4757 }
 0x657   :  { %3522 = vst.msk [vmem:[%s6413_s9 + $0xd0] sm:$0xff] %vm3111_vm2, %v3490_v39  ;;  %v3491_v21 = vsub.f32 %v6207_v18, %v3455_v57  ;;  %v3449_v36 = vmul.f32 0.6931472, %v4758_v44 }
 0x658   :  { %v4760_v52 = vpop.eup %4759  ;;  %v3390_v34 = vpop.xlane.xlu0 %3389 }
 0x659   :  { %3523 = vst.msk [vmem:[%s6413_s9 + $0xd8] sm:$0xff] %vm3111_vm2, %v3491_v21  ;;  %v3488_v62 = vsub.f32 %v6212_v61, %v3449_v36  ;;  %v3451_v40 = vmul.f32 0.6931472, %v4760_v52  ;;  %4761 = vlog2.f32 %v3390_v34 }
 0x65a   :  { %v3393_v37 = vpop.xlane.xlu1 %3392 }
 0x65b   :  { %3520 = vst.msk [vmem:[%s6413_s9 + $0xc0] sm:$0xff] %vm3111_vm2, %v3488_v62  ;;  %v3489_v18 = vsub.f32 %v6217_v31, %v3451_v40  ;;  %4763 = vlog2.f32 %v3393_v37 }
 0x65c   :  { %v3396_v17 = vpop.xlane.xlu0 %3395 }
 0x65d   :  { %3521 = vst.msk [vmem:[%s6413_s9 + $0xc8] sm:$0xff] %vm3111_vm2, %v3489_v18  ;;  %4765 = vlog2.f32 %v3396_v17 }
 0x65e   :  { %v3399_v63 = vpop.xlane.xlu1 %3398 }
 0x65f   :  { %4767 = vlog2.f32 %v3399_v63 }
 0x663   :  { %v4762_v61 = vpop.eup %4761 }
 0x664   :  { %v3457_v11 = vmul.f32 0.6931472, %v4762_v61 }
 0x665   :  { %v4764_v32 = vpop.eup %4763 }
 0x666   :  { %v3492_v16 = vsub.f32 %v6222_v49, %v3457_v11  ;;  %v3459_v12 = vmul.f32 0.6931472, %v4764_v32 }
 0x667   :  { %v4766_v26 = vpop.eup %4765 }
 0x668   :  { %3524 = vst.msk [vmem:[%s6413_s9 + $0xe0] sm:$0xff] %vm3111_vm2, %v3492_v16  ;;  %v3493_v31 = vsub.f32 %v6227_v19, %v3459_v12  ;;  %v3461_v58 = vmul.f32 0.6931472, %v4766_v26 }
 0x669   :  { %v4768_v29 = vpop.eup %4767 }
 0x66a   :  { %3525 = vst.msk [vmem:[%s6413_s9 + $0xe8] sm:$0xff] %vm3111_vm2, %v3493_v31  ;;  %v3494_v28 = vsub.f32 %v6232_v0, %v3461_v58  ;;  %v3463_v5 = vmul.f32 0.6931472, %v4768_v29 }
 0x66c   :  { %3526 = vst.msk [vmem:[%s6413_s9 + $0xf0] sm:$0xff] %vm3111_vm2, %v3494_v28  ;;  %v3495_v49 = vsub.f32 %v6237_v55, %v3463_v5 }
 0x66e   :  { %3527 = vst.msk [vmem:[%s6413_s9 + $0xf8] sm:$0xff] %vm3111_vm2, %v3495_v49 }

</bundles_post_ra>
